<compile_context>
chip_gen: v5e
topology: v5e:2x2
jax: 0.10.0
libtpu: 0.0.40
codegen_flags: <defaults>
</compile_context>

<pallas_src>
import functools

import jax
import jax.numpy as jnp
from jax import lax
from jax.experimental import pallas as pl
from jax.experimental.pallas import tpu as pltpu

# --- module hyperparameters (small, consistent with the PyTorch module) ---
D_MSA = 32          # d_msa  (q_dim/k_dim/v_dim)
D_HID = 8           # head_dim
NUM_HEADS = 4
TOTAL = D_HID * NUM_HEADS
LN_EPS = 1e-5
N_SEQ = 8           # number of sequences in the MSA (attention axis)
N_RES = 16          # number of residues (columns)
BLOCK_R = 8         # residue columns per grid step (grid of 2)


def _msa_col_attn_kernel(m_ref, w_ref, b_ref, wo_ref, out_ref, o_acc, *,
                         num_heads, head_dim, block_r):
    # m_ref block: (S, block_r*C) lane-dense tile (all sequences, Rb residues).
    S = m_ref.shape[0]
    Rb = block_r
    C = m_ref.shape[1] // Rb
    SR = S * Rb
    total = num_heads * head_dim
    mm_dtype = w_ref.dtype          # f32 or bf16, decided once in the wrapper

    # Put residues on the leading axis (rows ordered (residue, sequence)) so
    # the per-residue attention batch below is a free leading-dim split.  This
    # is a small on-chip XLU transpose (2 KiB/step), not an HBM round trip.
    x = pltpu.einshape("srd->rsd", m_ref[...].reshape(S, Rb, C)).reshape(SR, C)

    # ---- LayerNorm over channels (f32; gamma/beta folded into w/b) ---------
    mean = jnp.mean(x, axis=-1, keepdims=True)
    var = jnp.mean(jnp.square(x - mean), axis=-1, keepdims=True)
    xh = (x - mean) * lax.rsqrt(var + LN_EPS)

    # ---- fused q|k|v|g projection: one (SR, C) x (C, 4*total) matmul --------
    # head_dim**-0.5 is folded into the Wq columns; b_ref carries beta@W + bg.
    proj = jnp.dot(xh.astype(mm_dtype), w_ref[...],
                   preferred_element_type=jnp.float32) + b_ref[...]   # (SR, 4T)
    q = proj[:, 0 * total:1 * total]
    k = proj[:, 1 * total:2 * total]
    v = proj[:, 2 * total:3 * total]
    g = proj[:, 3 * total:4 * total]
    sig_g = jax.nn.sigmoid(g)                                          # f32

    # ---- attention over the sequence axis, batched over residues ------------
    # Each head: (Rb, S, dh) x (Rb, S, dh) -> (Rb, S, S) -- no cross-residue
    # mask, no redundant FLOPs, logits stay O(Rb*S^2).
    # TODO(synk): also fold the head loop into the batch dim (einshape
    # "rshd->rhsd" + a single (Rb*H)-batched dot) after verifying on hardware.
    for h in range(num_heads):
        sl = slice(h * head_dim, (h + 1) * head_dim)
        qh = q[:, sl].reshape(Rb, S, head_dim).astype(mm_dtype)
        kh = k[:, sl].reshape(Rb, S, head_dim).astype(mm_dtype)
        vh = v[:, sl].reshape(Rb, S, head_dim).astype(mm_dtype)
        logits = jnp.einsum('rsd,rtd->rst', qh, kh,
                            preferred_element_type=jnp.float32)        # f32
        logits = logits - jnp.max(logits, axis=-1, keepdims=True)
        p = jnp.exp(logits)
        p = p * pl.reciprocal(jnp.sum(p, axis=-1, keepdims=True), approx=True)
        oh = jnp.einsum('rst,rtd->rsd', p.astype(mm_dtype), vh,
                        preferred_element_type=jnp.float32)            # (Rb,S,dh)
        # Gated head output into the preallocated lane-slab accumulator
        # (avoids concatenating 8-lane slices).
        o_acc[:, sl] = sig_g[:, sl] * oh.reshape(SR, head_dim)

    # ---- output projection (weight only, no bias in the reference forward) --
    out = jnp.dot(o_acc[...].astype(mm_dtype), wo_ref[...],
                  preferred_element_type=jnp.float32)                  # (SR, C)

    # Back to the lane-dense (S, Rb*C) layout so the HBM store is unmasked.
    out_ref[...] = pltpu.einshape("rsd->srd",
                                  out.reshape(Rb, S, C)).reshape(S, Rb * C)


@functools.partial(jax.jit, static_argnames=("block_r", "use_bf16_mxu"))
def msa_column_attention(m, gamma, beta, wq, wk, wv, wg, bg, wo_t,
                         *, block_r=BLOCK_R, use_bf16_mxu=True):
    """m: (N_seq, N_res, d_msa) f32.  Returns the same shape.

    No wrapper transposes / HBM round trips: only free contiguous reshapes.
    bf16 MXU operands are valid on v5e/v6e/v7x (elementwise math stays f32).
    TODO(synk): at production sizes retune block_r against VMEM (64 MiB on
    v7x) and set vmem_limit_bytes explicitly; keep several residue blocks per
    TensorCore so both v7x cores get double-buffered work.
    """
    S, R, C = m.shape
    assert R % block_r == 0, (R, block_r)
    total = TOTAL
    norm = D_HID ** (-0.5)
    mm_dtype = jnp.bfloat16 if use_bf16_mxu else jnp.float32

    # --- fuse the four projections + LayerNorm affine + q-scaling (trace-time)
    w_cat = jnp.concatenate([wq * norm, wk, wv, wg], axis=1)          # (C, 4T)
    w_fused = (gamma[:, None] * w_cat).astype(mm_dtype)               # fold LN gamma
    b_fused = (beta[None, :] @ w_cat) + jnp.concatenate(              # fold LN beta
        [jnp.zeros((3 * total,), jnp.float32), bg])[None, :]          # + gating bias
    wo_mm = wo_t.astype(mm_dtype)

    # --- lane-dense layout: (S, R, C) -> (S, R*C) is a free contiguous reshape
    m2 = m.reshape(S, R * C)

    kernel = functools.partial(
        _msa_col_attn_kernel, num_heads=NUM_HEADS, head_dim=D_HID,
        block_r=block_r)

    out2 = pl.pallas_call(
        kernel,
        out_shape=jax.ShapeDtypeStruct((S, R * C), jnp.float32),
        grid_spec=pltpu.PrefetchScalarGridSpec(
            num_scalar_prefetch=0,
            grid=(R // block_r,),
            in_specs=[
                pl.BlockSpec((S, block_r * C), lambda r: (0, r)),     # m tile
                pl.BlockSpec((C, 4 * total), lambda r: (0, 0)),       # fused W
                pl.BlockSpec((1, 4 * total), lambda r: (0, 0)),       # fused b
                pl.BlockSpec((total, C), lambda r: (0, 0)),           # Wo^T
            ],
            out_specs=pl.BlockSpec((S, block_r * C), lambda r: (0, r)),
            scratch_shapes=[
                pltpu.VMEM((S * block_r, total), jnp.float32),        # gated o
            ],
        ),
        compiler_params=pltpu.CompilerParams(
            # Residue blocks are independent -> v7x's 2 TensorCores split them;
            # no effect on single-TC v5e/v6e.
            dimension_semantics=("parallel",)),
    )(m2, w_fused, b_fused, wo_mm)
    return out2.reshape(S, R, C)


def _reference(m, gamma, beta, wq, wk, wv, wg, bg, wo_t):
    """Pure-JAX reference mirroring the PyTorch forward."""
    mt = jnp.swapaxes(m, -2, -3)                             # (R, S, C)
    mean = jnp.mean(mt, -1, keepdims=True)
    var = jnp.mean(jnp.square(mt - mean), -1, keepdims=True)
    xn = (mt - mean) / jnp.sqrt(var + LN_EPS) * gamma + beta
    q = (xn @ wq) * (D_HID ** -0.5)
    k = xn @ wk
    v = xn @ wv
    g = xn @ wg + bg
    R, S, _ = xn.shape

    def split(x):
        return x.reshape(R, S, NUM_HEADS, D_HID).transpose(0, 2, 1, 3)

    qh, kh, vh = split(q), split(k), split(v)
    logits = jnp.einsum('rhsd,rhtd->rhst', qh, kh)
    attn = jax.nn.softmax(logits, axis=-1)
    o = jnp.einsum('rhst,rhtd->rhsd', attn, vh)
    o = o.transpose(0, 2, 1, 3).reshape(R, S, TOTAL)
    o = jax.nn.sigmoid(g) * o
    out = o @ wo_t
    return jnp.swapaxes(out, -2, -3)


def _init_params(key):
    ks = jax.random.split(key, 8)

    def glorot(k, fan_in, fan_out):
        scale = jnp.sqrt(6.0 / (fan_in + fan_out))
        return jax.random.uniform(k, (fan_in, fan_out), jnp.float32, -scale, scale)

    # Slightly perturbed LN affine so the folded-gamma/beta path is exercised.
    gamma = 1.0 + 0.1 * jax.random.normal(ks[5], (D_MSA,), jnp.float32)
    beta = 0.1 * jax.random.normal(ks[6], (D_MSA,), jnp.float32)
    wq = glorot(ks[0], D_MSA, TOTAL)
    wk = glorot(ks[1], D_MSA, TOTAL)
    wv = glorot(ks[2], D_MSA, TOTAL)
    # gating linear: small random weight + ones bias (UniFold 'gating' init is
    # zeros/ones; use small weight so the test is non-trivial).
    wg = 0.02 * jax.random.normal(ks[3], (D_MSA, TOTAL), jnp.float32)
    bg = jnp.ones((TOTAL,), jnp.float32)
    # output projection ('final' init is zeros; use small random, pre-transposed).
    wo_t = 0.02 * jax.random.normal(ks[4], (TOTAL, D_MSA), jnp.float32)
    return gamma, beta, wq, wk, wv, wg, bg, wo_t


if __name__ == "__main__":
    key = jax.random.PRNGKey(0)
    k_m, k_p = jax.random.split(key)
    m = jax.random.normal(k_m, (N_SEQ, N_RES, D_MSA), jnp.float32)
    params = _init_params(k_p)

    ref = _reference(m, *params)

    # f32 MXU operands (exact path; tolerance covers the approx reciprocal).
    out = msa_column_attention(m, *params, block_r=BLOCK_R, use_bf16_mxu=False)
    out = jax.block_until_ready(out)
    assert out.shape == m.shape
    err = float(jnp.max(jnp.abs(out - ref)))
    assert jnp.allclose(out, ref, rtol=2e-3, atol=1e-3), f"f32 max err {err}"

    # bf16 MXU operands (valid on v5e/v6e/v7x; f32 accumulation & elementwise).
    out_bf16 = msa_column_attention(m, *params, block_r=BLOCK_R,
                                    use_bf16_mxu=True)
    out_bf16 = jax.block_until_ready(out_bf16)
    err_b = float(jnp.max(jnp.abs(out_bf16 - ref)))
    assert jnp.allclose(out_bf16, ref, rtol=5e-2, atol=5e-2), (
        f"bf16 max err {err_b}")

    print("KERNEL_OK")
</pallas_src>

<mosaic_0001>
module attributes {stable_mosaic.version = 11 : i64} {
  func.func @_msa_col_attn_kernel(%arg0: i32, %arg1: memref<8x256xf32, #tpu.memory_space<vmem>>, %arg2: memref<32x128xf32, #tpu.memory_space<vmem>>, %arg3: memref<1x128xf32, #tpu.memory_space<vmem>>, %arg4: memref<32x32xf32, #tpu.memory_space<vmem>>, %arg5: memref<8x256xf32, #tpu.memory_space<vmem>>, %arg6: memref<64x32xf32, #tpu.memory_space<vmem>>) attributes {dimension_semantics = [#tpu.dimension_semantics<parallel>], iteration_bounds = array<i64: 2>, scalar_prefetch = 0 : i64, scratch_operands = 1 : i64, tpu.core_type = #tpu.core_type<tc>, window_params = [{transform_indices = @transform_0, window_bounds = array<i64: 8, 256>}, {pipeline_mode = #tpu.pipeline_mode<synchronous>, transform_indices = @transform_1, window_bounds = array<i64: 32, 128>}, {pipeline_mode = #tpu.pipeline_mode<synchronous>, transform_indices = @transform_2, window_bounds = array<i64: 1, 128>}, {pipeline_mode = #tpu.pipeline_mode<synchronous>, transform_indices = @transform_3, window_bounds = array<i64: 32, 32>}, {transform_indices = @transform_4, window_bounds = array<i64: 8, 256>}]} {
    %c0 = arith.constant 0 : index
    %c0_0 = arith.constant 0 : index
    %0 = vector.load %arg1[%c0, %c0_0] : memref<8x256xf32, #tpu.memory_space<vmem>>, vector<8x256xf32>
    %1 = vector.shape_cast %0 : vector<8x256xf32> to vector<8x8x32xf32>
    %2 = tpu.transpose %1, [1, 0, 2] : vector<8x8x32xf32> -> vector<8x8x32xf32>
    %3 = vector.shape_cast %2 : vector<8x8x32xf32> to vector<64x32xf32>
    %cst = arith.constant dense<0.000000e+00> : vector<64xf32>
    %4 = vector.multi_reduction <add>, %3, %cst [1] : vector<64x32xf32> to vector<64xf32>
    %5 = vector.shape_cast %4 : vector<64xf32> to vector<64x1xf32>
    %cst_1 = arith.constant 3.200000e+01 : f32
    %6 = vector.broadcast %cst_1 : f32 to vector<64x1xf32>
    %7 = arith.divf %5, %6 : vector<64x1xf32>
    %8 = vector.broadcast %7 : vector<64x1xf32> to vector<64x32xf32>
    %9 = arith.subf %3, %8 : vector<64x32xf32>
    %10 = arith.mulf %9, %9 : vector<64x32xf32>
    %cst_2 = arith.constant dense<0.000000e+00> : vector<64xf32>
    %11 = vector.multi_reduction <add>, %10, %cst_2 [1] : vector<64x32xf32> to vector<64xf32>
    %12 = vector.shape_cast %11 : vector<64xf32> to vector<64x1xf32>
    %cst_3 = arith.constant 3.200000e+01 : f32
    %13 = vector.broadcast %cst_3 : f32 to vector<64x1xf32>
    %14 = arith.divf %12, %13 : vector<64x1xf32>
    %15 = vector.broadcast %7 : vector<64x1xf32> to vector<64x32xf32>
    %16 = arith.subf %3, %15 : vector<64x32xf32>
    %cst_4 = arith.constant 9.99999974E-6 : f32
    %17 = vector.broadcast %cst_4 : f32 to vector<64x1xf32>
    %18 = arith.addf %14, %17 : vector<64x1xf32>
    %19 = math.rsqrt %18 : vector<64x1xf32>
    %20 = vector.broadcast %19 : vector<64x1xf32> to vector<64x32xf32>
    %21 = arith.mulf %16, %20 : vector<64x32xf32>
    %c0_5 = arith.constant 0 : index
    %c0_6 = arith.constant 0 : index
    %22 = vector.load %arg2[%c0_5, %c0_6] : memref<32x128xf32, #tpu.memory_space<vmem>>, vector<32x128xf32>
    %cst_7 = arith.constant dense<0.000000e+00> : vector<64x128xf32>
    %23 = tpu.matmul %21, %22, %cst_7 {dimension_numbers = #tpu.dot_dimension_numbers<[1], [0], [0], [1], [0, 0, 1, 1], [], []>} : vector<64x32xf32>, vector<32x128xf32>, vector<64x128xf32> -> vector<64x128xf32>
    %c0_8 = arith.constant 0 : index
    %c0_9 = arith.constant 0 : index
    %24 = vector.load %arg3[%c0_8, %c0_9] : memref<1x128xf32, #tpu.memory_space<vmem>>, vector<1x128xf32>
    %25 = vector.broadcast %24 : vector<1x128xf32> to vector<64x128xf32>
    %26 = arith.addf %23, %25 : vector<64x128xf32>
    %27 = vector.extract_strided_slice %26 {offsets = [0, 0], sizes = [64, 32], strides = [1, 1]} : vector<64x128xf32> to vector<64x32xf32>
    %28 = vector.extract_strided_slice %26 {offsets = [0, 32], sizes = [64, 32], strides = [1, 1]} : vector<64x128xf32> to vector<64x32xf32>
    %29 = vector.extract_strided_slice %26 {offsets = [0, 64], sizes = [64, 32], strides = [1, 1]} : vector<64x128xf32> to vector<64x32xf32>
    %30 = vector.extract_strided_slice %26 {offsets = [0, 96], sizes = [64, 32], strides = [1, 1]} : vector<64x128xf32> to vector<64x32xf32>
    %31 = arith.negf %30 : vector<64x32xf32>
    %32 = math.exp %31 : vector<64x32xf32>
    %cst_10 = arith.constant 1.000000e+00 : f32
    %33 = vector.broadcast %cst_10 : f32 to vector<64x32xf32>
    %34 = arith.addf %33, %32 : vector<64x32xf32>
    %35 = arith.divf %33, %34 : vector<64x32xf32>
    %36 = vector.extract_strided_slice %27 {offsets = [0, 0], sizes = [64, 8], strides = [1, 1]} : vector<64x32xf32> to vector<64x8xf32>
    %37 = vector.shape_cast %36 : vector<64x8xf32> to vector<8x8x8xf32>
    %38 = vector.extract_strided_slice %28 {offsets = [0, 0], sizes = [64, 8], strides = [1, 1]} : vector<64x32xf32> to vector<64x8xf32>
    %39 = vector.shape_cast %38 : vector<64x8xf32> to vector<8x8x8xf32>
    %40 = vector.extract_strided_slice %29 {offsets = [0, 0], sizes = [64, 8], strides = [1, 1]} : vector<64x32xf32> to vector<64x8xf32>
    %41 = vector.shape_cast %40 : vector<64x8xf32> to vector<8x8x8xf32>
    "tpu.trace_start"() <{level = 10 : i32, message = "rsd,rtd->rst"}> : () -> ()
    %cst_11 = arith.constant dense<0.000000e+00> : vector<8x8x8xf32>
    %42 = tpu.matmul %37, %39, %cst_11 {dimension_numbers = #tpu.dot_dimension_numbers<[2], [2], [1], [1], [0, 0, 0, 1, 1, 1], [0], [0]>} : vector<8x8x8xf32>, vector<8x8x8xf32>, vector<8x8x8xf32> -> vector<8x8x8xf32>
    "tpu.trace_stop"() : () -> ()
    %cst_12 = arith.constant dense<0xFF800000> : vector<8x8xf32>
    %43 = vector.multi_reduction <maximumf>, %42, %cst_12 [2] : vector<8x8x8xf32> to vector<8x8xf32>
    %44 = vector.shape_cast %43 : vector<8x8xf32> to vector<8x8x1xf32>
    %45 = vector.broadcast %44 : vector<8x8x1xf32> to vector<8x8x8xf32>
    %46 = arith.subf %42, %45 : vector<8x8x8xf32>
    %47 = math.exp %46 : vector<8x8x8xf32>
    %cst_13 = arith.constant dense<0.000000e+00> : vector<8x8xf32>
    %48 = vector.multi_reduction <add>, %47, %cst_13 [2] : vector<8x8x8xf32> to vector<8x8xf32>
    %49 = vector.shape_cast %48 : vector<8x8xf32> to vector<8x8x1xf32>
    %50 = tpu.reciprocal %49 {approx = true} : vector<8x8x1xf32> -> vector<8x8x1xf32>
    %51 = vector.broadcast %50 : vector<8x8x1xf32> to vector<8x8x8xf32>
    %52 = arith.mulf %47, %51 : vector<8x8x8xf32>
    "tpu.trace_start"() <{level = 10 : i32, message = "rst,rtd->rsd"}> : () -> ()
    %cst_14 = arith.constant dense<0.000000e+00> : vector<8x8x8xf32>
    %53 = tpu.matmul %52, %41, %cst_14 {dimension_numbers = #tpu.dot_dimension_numbers<[2], [1], [1], [2], [0, 0, 0, 1, 1, 2], [0], [0]>} : vector<8x8x8xf32>, vector<8x8x8xf32>, vector<8x8x8xf32> -> vector<8x8x8xf32>
    "tpu.trace_stop"() : () -> ()
    %54 = vector.extract_strided_slice %35 {offsets = [0, 0], sizes = [64, 8], strides = [1, 1]} : vector<64x32xf32> to vector<64x8xf32>
    %55 = vector.shape_cast %53 : vector<8x8x8xf32> to vector<64x8xf32>
    %56 = arith.mulf %54, %55 : vector<64x8xf32>
    %c0_15 = arith.constant 0 : index
    %c0_16 = arith.constant 0 : index
    %57 = vector.load %arg6[%c0_15, %c0_16] : memref<64x32xf32, #tpu.memory_space<vmem>>, vector<64x8xf32>
    tpu.vector_store %arg6[%c0_15, %c0_16], %56 {strides = array<i32>} : memref<64x32xf32, #tpu.memory_space<vmem>>, vector<64x8xf32>,
    %58 = vector.extract_strided_slice %27 {offsets = [0, 8], sizes = [64, 8], strides = [1, 1]} : vector<64x32xf32> to vector<64x8xf32>
    %59 = vector.shape_cast %58 : vector<64x8xf32> to vector<8x8x8xf32>
    %60 = vector.extract_strided_slice %28 {offsets = [0, 8], sizes = [64, 8], strides = [1, 1]} : vector<64x32xf32> to vector<64x8xf32>
    %61 = vector.shape_cast %60 : vector<64x8xf32> to vector<8x8x8xf32>
    %62 = vector.extract_strided_slice %29 {offsets = [0, 8], sizes = [64, 8], strides = [1, 1]} : vector<64x32xf32> to vector<64x8xf32>
    %63 = vector.shape_cast %62 : vector<64x8xf32> to vector<8x8x8xf32>
    "tpu.trace_start"() <{level = 10 : i32, message = "rsd,rtd->rst"}> : () -> ()
    %cst_17 = arith.constant dense<0.000000e+00> : vector<8x8x8xf32>
    %64 = tpu.matmul %59, %61, %cst_17 {dimension_numbers = #tpu.dot_dimension_numbers<[2], [2], [1], [1], [0, 0, 0, 1, 1, 1], [0], [0]>} : vector<8x8x8xf32>, vector<8x8x8xf32>, vector<8x8x8xf32> -> vector<8x8x8xf32>
    "tpu.trace_stop"() : () -> ()
    %cst_18 = arith.constant dense<0xFF800000> : vector<8x8xf32>
    %65 = vector.multi_reduction <maximumf>, %64, %cst_18 [2] : vector<8x8x8xf32> to vector<8x8xf32>
    %66 = vector.shape_cast %65 : vector<8x8xf32> to vector<8x8x1xf32>
    %67 = vector.broadcast %66 : vector<8x8x1xf32> to vector<8x8x8xf32>
    %68 = arith.subf %64, %67 : vector<8x8x8xf32>
    %69 = math.exp %68 : vector<8x8x8xf32>
    %cst_19 = arith.constant dense<0.000000e+00> : vector<8x8xf32>
    %70 = vector.multi_reduction <add>, %69, %cst_19 [2] : vector<8x8x8xf32> to vector<8x8xf32>
    %71 = vector.shape_cast %70 : vector<8x8xf32> to vector<8x8x1xf32>
    %72 = tpu.reciprocal %71 {approx = true} : vector<8x8x1xf32> -> vector<8x8x1xf32>
    %73 = vector.broadcast %72 : vector<8x8x1xf32> to vector<8x8x8xf32>
    %74 = arith.mulf %69, %73 : vector<8x8x8xf32>
    "tpu.trace_start"() <{level = 10 : i32, message = "rst,rtd->rsd"}> : () -> ()
    %cst_20 = arith.constant dense<0.000000e+00> : vector<8x8x8xf32>
    %75 = tpu.matmul %74, %63, %cst_20 {dimension_numbers = #tpu.dot_dimension_numbers<[2], [1], [1], [2], [0, 0, 0, 1, 1, 2], [0], [0]>} : vector<8x8x8xf32>, vector<8x8x8xf32>, vector<8x8x8xf32> -> vector<8x8x8xf32>
    "tpu.trace_stop"() : () -> ()
    %76 = vector.extract_strided_slice %35 {offsets = [0, 8], sizes = [64, 8], strides = [1, 1]} : vector<64x32xf32> to vector<64x8xf32>
    %77 = vector.shape_cast %75 : vector<8x8x8xf32> to vector<64x8xf32>
    %78 = arith.mulf %76, %77 : vector<64x8xf32>
    %c0_21 = arith.constant 0 : index
    %c8 = arith.constant 8 : index
    %79 = vector.load %arg6[%c0_21, %c8] : memref<64x32xf32, #tpu.memory_space<vmem>>, vector<64x8xf32>
    tpu.vector_store %arg6[%c0_21, %c8], %78 {strides = array<i32>} : memref<64x32xf32, #tpu.memory_space<vmem>>, vector<64x8xf32>,
    %80 = vector.extract_strided_slice %27 {offsets = [0, 16], sizes = [64, 8], strides = [1, 1]} : vector<64x32xf32> to vector<64x8xf32>
    %81 = vector.shape_cast %80 : vector<64x8xf32> to vector<8x8x8xf32>
    %82 = vector.extract_strided_slice %28 {offsets = [0, 16], sizes = [64, 8], strides = [1, 1]} : vector<64x32xf32> to vector<64x8xf32>
    %83 = vector.shape_cast %82 : vector<64x8xf32> to vector<8x8x8xf32>
    %84 = vector.extract_strided_slice %29 {offsets = [0, 16], sizes = [64, 8], strides = [1, 1]} : vector<64x32xf32> to vector<64x8xf32>
    %85 = vector.shape_cast %84 : vector<64x8xf32> to vector<8x8x8xf32>
    "tpu.trace_start"() <{level = 10 : i32, message = "rsd,rtd->rst"}> : () -> ()
    %cst_22 = arith.constant dense<0.000000e+00> : vector<8x8x8xf32>
    %86 = tpu.matmul %81, %83, %cst_22 {dimension_numbers = #tpu.dot_dimension_numbers<[2], [2], [1], [1], [0, 0, 0, 1, 1, 1], [0], [0]>} : vector<8x8x8xf32>, vector<8x8x8xf32>, vector<8x8x8xf32> -> vector<8x8x8xf32>
    "tpu.trace_stop"() : () -> ()
    %cst_23 = arith.constant dense<0xFF800000> : vector<8x8xf32>
    %87 = vector.multi_reduction <maximumf>, %86, %cst_23 [2] : vector<8x8x8xf32> to vector<8x8xf32>
    %88 = vector.shape_cast %87 : vector<8x8xf32> to vector<8x8x1xf32>
    %89 = vector.broadcast %88 : vector<8x8x1xf32> to vector<8x8x8xf32>
    %90 = arith.subf %86, %89 : vector<8x8x8xf32>
    %91 = math.exp %90 : vector<8x8x8xf32>
    %cst_24 = arith.constant dense<0.000000e+00> : vector<8x8xf32>
    %92 = vector.multi_reduction <add>, %91, %cst_24 [2] : vector<8x8x8xf32> to vector<8x8xf32>
    %93 = vector.shape_cast %92 : vector<8x8xf32> to vector<8x8x1xf32>
    %94 = tpu.reciprocal %93 {approx = true} : vector<8x8x1xf32> -> vector<8x8x1xf32>
    %95 = vector.broadcast %94 : vector<8x8x1xf32> to vector<8x8x8xf32>
    %96 = arith.mulf %91, %95 : vector<8x8x8xf32>
    "tpu.trace_start"() <{level = 10 : i32, message = "rst,rtd->rsd"}> : () -> ()
    %cst_25 = arith.constant dense<0.000000e+00> : vector<8x8x8xf32>
    %97 = tpu.matmul %96, %85, %cst_25 {dimension_numbers = #tpu.dot_dimension_numbers<[2], [1], [1], [2], [0, 0, 0, 1, 1, 2], [0], [0]>} : vector<8x8x8xf32>, vector<8x8x8xf32>, vector<8x8x8xf32> -> vector<8x8x8xf32>
    "tpu.trace_stop"() : () -> ()
    %98 = vector.extract_strided_slice %35 {offsets = [0, 16], sizes = [64, 8], strides = [1, 1]} : vector<64x32xf32> to vector<64x8xf32>
    %99 = vector.shape_cast %97 : vector<8x8x8xf32> to vector<64x8xf32>
    %100 = arith.mulf %98, %99 : vector<64x8xf32>
    %c0_26 = arith.constant 0 : index
    %c16 = arith.constant 16 : index
    %101 = vector.load %arg6[%c0_26, %c16] : memref<64x32xf32, #tpu.memory_space<vmem>>, vector<64x8xf32>
    tpu.vector_store %arg6[%c0_26, %c16], %100 {strides = array<i32>} : memref<64x32xf32, #tpu.memory_space<vmem>>, vector<64x8xf32>,
    %102 = vector.extract_strided_slice %27 {offsets = [0, 24], sizes = [64, 8], strides = [1, 1]} : vector<64x32xf32> to vector<64x8xf32>
    %103 = vector.shape_cast %102 : vector<64x8xf32> to vector<8x8x8xf32>
    %104 = vector.extract_strided_slice %28 {offsets = [0, 24], sizes = [64, 8], strides = [1, 1]} : vector<64x32xf32> to vector<64x8xf32>
    %105 = vector.shape_cast %104 : vector<64x8xf32> to vector<8x8x8xf32>
    %106 = vector.extract_strided_slice %29 {offsets = [0, 24], sizes = [64, 8], strides = [1, 1]} : vector<64x32xf32> to vector<64x8xf32>
    %107 = vector.shape_cast %106 : vector<64x8xf32> to vector<8x8x8xf32>
    "tpu.trace_start"() <{level = 10 : i32, message = "rsd,rtd->rst"}> : () -> ()
    %cst_27 = arith.constant dense<0.000000e+00> : vector<8x8x8xf32>
    %108 = tpu.matmul %103, %105, %cst_27 {dimension_numbers = #tpu.dot_dimension_numbers<[2], [2], [1], [1], [0, 0, 0, 1, 1, 1], [0], [0]>} : vector<8x8x8xf32>, vector<8x8x8xf32>, vector<8x8x8xf32> -> vector<8x8x8xf32>
    "tpu.trace_stop"() : () -> ()
    %cst_28 = arith.constant dense<0xFF800000> : vector<8x8xf32>
    %109 = vector.multi_reduction <maximumf>, %108, %cst_28 [2] : vector<8x8x8xf32> to vector<8x8xf32>
    %110 = vector.shape_cast %109 : vector<8x8xf32> to vector<8x8x1xf32>
    %111 = vector.broadcast %110 : vector<8x8x1xf32> to vector<8x8x8xf32>
    %112 = arith.subf %108, %111 : vector<8x8x8xf32>
    %113 = math.exp %112 : vector<8x8x8xf32>
    %cst_29 = arith.constant dense<0.000000e+00> : vector<8x8xf32>
    %114 = vector.multi_reduction <add>, %113, %cst_29 [2] : vector<8x8x8xf32> to vector<8x8xf32>
    %115 = vector.shape_cast %114 : vector<8x8xf32> to vector<8x8x1xf32>
    %116 = tpu.reciprocal %115 {approx = true} : vector<8x8x1xf32> -> vector<8x8x1xf32>
    %117 = vector.broadcast %116 : vector<8x8x1xf32> to vector<8x8x8xf32>
    %118 = arith.mulf %113, %117 : vector<8x8x8xf32>
    "tpu.trace_start"() <{level = 10 : i32, message = "rst,rtd->rsd"}> : () -> ()
    %cst_30 = arith.constant dense<0.000000e+00> : vector<8x8x8xf32>
    %119 = tpu.matmul %118, %107, %cst_30 {dimension_numbers = #tpu.dot_dimension_numbers<[2], [1], [1], [2], [0, 0, 0, 1, 1, 2], [0], [0]>} : vector<8x8x8xf32>, vector<8x8x8xf32>, vector<8x8x8xf32> -> vector<8x8x8xf32>
    "tpu.trace_stop"() : () -> ()
    %120 = vector.extract_strided_slice %35 {offsets = [0, 24], sizes = [64, 8], strides = [1, 1]} : vector<64x32xf32> to vector<64x8xf32>
    %121 = vector.shape_cast %119 : vector<8x8x8xf32> to vector<64x8xf32>
    %122 = arith.mulf %120, %121 : vector<64x8xf32>
    %c0_31 = arith.constant 0 : index
    %c24 = arith.constant 24 : index
    %123 = vector.load %arg6[%c0_31, %c24] : memref<64x32xf32, #tpu.memory_space<vmem>>, vector<64x8xf32>
    tpu.vector_store %arg6[%c0_31, %c24], %122 {strides = array<i32>} : memref<64x32xf32, #tpu.memory_space<vmem>>, vector<64x8xf32>,
    %c0_32 = arith.constant 0 : index
    %c0_33 = arith.constant 0 : index
    %124 = vector.load %arg6[%c0_32, %c0_33] : memref<64x32xf32, #tpu.memory_space<vmem>>, vector<64x32xf32>
    %c0_34 = arith.constant 0 : index
    %c0_35 = arith.constant 0 : index
    %125 = vector.load %arg4[%c0_34, %c0_35] : memref<32x32xf32, #tpu.memory_space<vmem>>, vector<32x32xf32>
    %cst_36 = arith.constant dense<0.000000e+00> : vector<64x32xf32>
    %126 = tpu.matmul %124, %125, %cst_36 {dimension_numbers = #tpu.dot_dimension_numbers<[1], [0], [0], [1], [0, 0, 1, 1], [], []>} : vector<64x32xf32>, vector<32x32xf32>, vector<64x32xf32> -> vector<64x32xf32>
    %127 = vector.shape_cast %126 : vector<64x32xf32> to vector<8x8x32xf32>
    %128 = tpu.transpose %127, [1, 0, 2] : vector<8x8x32xf32> -> vector<8x8x32xf32>
    %129 = vector.shape_cast %128 : vector<8x8x32xf32> to vector<8x256xf32>
    %c0_37 = arith.constant 0 : index
    %c0_38 = arith.constant 0 : index
    %130 = vector.load %arg5[%c0_37, %c0_38] : memref<8x256xf32, #tpu.memory_space<vmem>>, vector<8x256xf32>
    tpu.vector_store %arg5[%c0_37, %c0_38], %129 {strides = array<i32>} : memref<8x256xf32, #tpu.memory_space<vmem>>, vector<8x256xf32>,
    return
  }
  func.func @transform_0(%arg0: i32) -> (i32, i32) {
    %c0_i32 = arith.constant 0 : i32
    %c0_i32_0 = arith.constant 0 : i32
    return %c0_i32, %arg0 : i32, i32
  }
  func.func @transform_1(%arg0: i32) -> (i32, i32) {
    %c0_i32 = arith.constant 0 : i32
    %c0_i32_0 = arith.constant 0 : i32
    %c0_i32_1 = arith.constant 0 : i32
    return %c0_i32, %c0_i32_0 : i32, i32
  }
  func.func @transform_2(%arg0: i32) -> (i32, i32) {
    %c0_i32 = arith.constant 0 : i32
    %c0_i32_0 = arith.constant 0 : i32
    %c0_i32_1 = arith.constant 0 : i32
    return %c0_i32, %c0_i32_0 : i32, i32
  }
  func.func @transform_3(%arg0: i32) -> (i32, i32) {
    %c0_i32 = arith.constant 0 : i32
    %c0_i32_0 = arith.constant 0 : i32
    %c0_i32_1 = arith.constant 0 : i32
    return %c0_i32, %c0_i32_0 : i32, i32
  }
  func.func @transform_4(%arg0: i32) -> (i32, i32) {
    %c0_i32 = arith.constant 0 : i32
    %c0_i32_0 = arith.constant 0 : i32
    return %c0_i32, %arg0 : i32, i32
  }
}

</mosaic_0001>

<bundles_post_ra>
// kernel: msa_column_attention.1
= control target key start
LH: loop header
LB: loop body
LE: loop exit
PB: predicated region body
PF: predicated region fallthrough
CT: control target
= control target key end

     0   :  { %s4108_s15 = smov 0   ;;  %s5261_s0 = inlined_call_operand.vmem [shape: f32[8,512], index: 0, kind: input, shape index: {}]   ;;  %s5262_s1 = inlined_call_operand.vmem [shape: f32[32,128], index: 1, kind: input, shape index: {}]   ;;  %s5263_s2 = inlined_call_operand.vmem [shape: f32[1,128], index: 2, kind: input, shape index: {}]   ;;  %s5264_s3 = inlined_call_operand.vmem [shape: f32[32,32], index: 3, kind: input, shape index: {}]   ;;  %s5265_s4 = inlined_call_operand.vmem [shape: f32[8,512], index: 4, kind: output, shape index: {}]  }
   0x1 LB: > { %s3644_s16 = sadd.s32 4294967295, %s4066_s15   ;;  %p3648_p0 = scmp.ge.s32.totalorder %s4066_s15, 1  ;;  %s4066_s15 = sphi %s4108_s15, %s14_s15  }
   0x2   : > { %p163_p1 = scmp.lt.s32.totalorder %s4066_s15, 3 }
   0x4   : > { %p164_p2 = pnand %p3648_p0, %p163_p1 }
   0x5   : > { %s3649_s17 = sshll.u32 (!%p164_p2), %s3644_s16, 1  ;;  %s4068_s22 = smov (!%p164_p2), 32  }
   0x6   : > { %167 = sbr.rel (%p164_p2) target bundleno = 3121 (0xc31), region = 36  ;;  %p190_p3 = scmp.lt.s32.totalorder (!%p164_p2), %s3649_s17, 3 }
   0x7   : > { %s4069_s23 = smov (!%p164_p2), 96   ;;  %s4070_s24 = smov (!%p164_p2), 64  }
   0x8   : > { %s4074_s9 = smov (!%p164_p2), 88   ;;  %s4075_s10 = smov (!%p164_p2), 120  }
   0x9   : > { %s4076_s11 = smov (!%p164_p2), 56   ;;  %s4077_s12 = smov (!%p164_p2), 112  }
   0xa   : > { %s4078_s13 = smov (!%p164_p2), 80   ;;  %s4079_s14 = smov (!%p164_p2), 48  }
   0xb   : > { %s5267_s17 = smov (!%p190_p3, %s3649_s17), 3  ;;  %v4071_v4 = vmov 1983009808   ;;  %vm224_vm0 = vcmask 1047556   ;;  %v4072_v21 = vmov 1934713408  }
   0xc   : > { %s3650_s18 = sshll.u32 %s5267_s17, 3  ;;  %v229_v5 = vunpack.c.l.s4 %v4071_v4  ;;  %v277_v22 = vunpack.c.l.s4 %v4072_v21  ;;  %vm448_vm1 = vcmask 261120   ;;  %s4080_s16 = smov 104  }
   0xd   : > { %s193_s21 = scalar_lea.vmem %s5261_s0, %s3650_s18  ;;  %s4081_s19 = smov 72  }
   0xe   : > { %v201_v0 = vld [vmem:[%s193_s21] sm:$0xff]  ;;  %v202_v1 = vld [vmem:[%s193_s21 + $0x8] sm:$0xff]  ;;  %v4131_v12 = vunpack.c.0.s8 %v229_v5  ;;  %v4142_v33 = vunpack.c.0.s8 %v277_v22  ;;  %s4082_s20 = smov 40   ;;  %s199_s6 = scalar_lea.vmem %s5265_s4, %s3650_s18 }
   0xf   : > { %210 = vrot.lane.b32.xlu1 %v201_v0, %s4068_s22  ;;  %204 = vrot.lane.b32.xlu0 %v201_v0, %s4069_s23  ;;  %v250_v6 = vrot.slane %v202_v1, 4  ;;  %v226_v19 = vrot.slane %v201_v0, 4 }
  0x10   : > { %217 = vrot.lane.b32.xlu2 %v202_v1, %s4070_s24 }
  0x17   : > { %214 = vrot.lane.b32.xlu1 %v202_v1, %s4069_s23  ;;  %207 = vrot.lane.b32.xlu0 %v201_v0, %s4070_s24 }
  0x18   : > { %220 = vrot.lane.b32.xlu2 %v202_v1, %s4068_s22 }
  0x6a   : > { %v218_v2 = vpop.permute.xlu2 %217 }
  0x6b   : > { %v248_v3 = vrot.slane %v218_v2, 4  ;;  %v251_v14 = vsel %vm224_vm0, %v218_v2, %v250_v6 }
  0x6c   : > { %v259_v20 = vperm.slane %v251_v14, %v4131_v12 }
  0x6d   : > { %v249_v9 = vsel %vm224_vm0, %v248_v3, %v202_v1 }
  0x6e   : > { %v255_v15 = vperm.slane %v249_v9, %v4131_v12  ;;  %v310_v32 = vrot.slane %v259_v20, 4 }
  0x70   : > { %v298_v25 = vrot.slane %v255_v15, 4 }
  0x72   : > { %v221_v13 = vpop.permute.xlu2 %220 }
  0x73   : > { %v260_v18 = vrot.slane %v221_v13, 4 }
  0x81   : > { %v211_v7 = vpop.permute.xlu1 %210  ;;  %v205_v8 = vpop.permute.xlu0 %204 }
  0x82   : > { %v236_v10 = vrot.slane %v211_v7, 4  ;;  %v238_v11 = vrot.slane %v205_v8, 4 }
  0x84   : > { %v237_v16 = vsel %vm224_vm0, %v236_v10, %v205_v8  ;;  %v239_v17 = vsel %vm224_vm0, %v211_v7, %v238_v11 }
  0x85   : > { %v243_v23 = vperm.slane %v237_v16, %v4131_v12  ;;  %v247_v24 = vperm.slane %v239_v17, %v4131_v12 }
  0x87   : > { %v272_v36 = vrot.slane %v243_v23, 4  ;;  %v284_v37 = vrot.slane %v247_v24, 4 }
  0x89   : > { %v215_v26 = vpop.permute.xlu1 %214  ;;  %v208_v27 = vpop.permute.xlu0 %207 }
  0x8a   : > { %v261_v28 = vsel %vm224_vm0, %v260_v18, %v215_v26  ;;  %v262_v29 = vrot.slane %v215_v26, 4  ;;  %v223_v30 = vrot.slane %v208_v27, 4  ;;  %v227_v31 = vsel %vm224_vm0, %v208_v27, %v226_v19 }
  0x8b   : > { %v267_v34 = vperm.slane %v261_v28, %v4131_v12  ;;  %v235_v35 = vperm.slane %v227_v31, %v4131_v12 }
  0x8c   : > { %v263_v38 = vsel %vm224_vm0, %v221_v13, %v262_v29  ;;  %v225_v39 = vsel %vm224_vm0, %v223_v30, %v201_v0 }
  0x8d   : > { %v271_v40 = vperm.slane %v263_v38, %v4131_v12  ;;  %v296_v41 = vrot.slane %v267_v34, 4  ;;  %v299_v42 = vsel %vm224_vm0, %v267_v34, %v298_v25  ;;  %v231_v43 = vperm.slane %v225_v39, %v4131_v12 }
  0x8e   : > { %v285_v44 = vsel %vm224_vm0, %v284_v37, %v235_v35  ;;  %v286_v45 = vrot.slane %v235_v35, 4  ;;  %v307_v51 = vperm.slane %v299_v42, %v4142_v33 }
  0x8f   : > { %v297_v46 = vsel %vm224_vm0, %v296_v41, %v255_v15  ;;  %v308_v47 = vrot.slane %v271_v40, 4  ;;  %v311_v48 = vsel %vm224_vm0, %v271_v40, %v310_v32  ;;  %v273_v49 = vsel %vm224_vm0, %v272_v36, %v231_v43 }
  0x90   : > { %v303_v50 = vperm.slane %v297_v46, %v4142_v33  ;;  %v319_v52 = vperm.slane %v311_v48, %v4142_v33  ;;  %v274_v53 = vrot.slane %v231_v43, 4  ;;  %v279_v55 = vperm.slane %v273_v49, %v4142_v33 }
  0x91   : > { %v309_v54 = vsel %vm224_vm0, %v308_v47, %v259_v20  ;;  %v287_v56 = vsel %vm224_vm0, %v247_v24, %v286_v45  ;;  %v291_v57 = vperm.slane %v285_v44, %v4142_v33  ;;  %v324_v2 = vrot.slane %v307_v51, 4 }
  0x92   : > { %v315_v58 = vperm.slane %v309_v54, %v4142_v33  ;;  %v320_v59 = vrot.slane %v303_v50, 4  ;;  %v332_v60 = vrot.slane %v319_v52, 4  ;;  %v275_v61 = vsel %vm224_vm0, %v243_v23, %v274_v53 }
  0x93   : > { %v283_v62 = vperm.slane %v275_v61, %v4142_v33  ;;  %v295_v63 = vperm.slane %v287_v56, %v4142_v33  ;;  %v322_v0 = vrot.slane %v279_v55, 4  ;;  %v330_v1 = vrot.slane %v291_v57, 4 }
  0x94   : > { %v328_v3 = vrot.slane %v315_v58, 4  ;;  %v321_v4 = vsel %vm224_vm0, %v320_v59, %v279_v55 }
  0x95   : > { %v326_v5 = vrot.slane %v283_v62, 4  ;;  %v331_v6 = vsel %vm224_vm0, %v315_v58, %v330_v1  ;;  %v333_v7 = vsel %vm224_vm0, %v332_v60, %v295_v63  ;;  %v334_v8 = vrot.slane %v295_v63, 4 }
  0x96   : > { %v329_v9 = vsel %vm224_vm0, %v328_v3, %v291_v57  ;;  %v360_v10 = vrot.slane %v333_v7, 4  ;;  %v374_v11 = vrot.slane %v331_v6, 4  ;;  %v323_v13 = vsel %vm224_vm0, %v303_v50, %v322_v0 }
  0x97   : > { %v335_v14 = vsel %vm224_vm0, %v319_v52, %v334_v8  ;;  %v362_v15 = vrot.slane %v329_v9, 4  ;;  %v325_v16 = vsel %vm224_vm0, %v324_v2, %v283_v62  ;;  %v327_v17 = vsel %vm224_vm0, %v307_v51, %v326_v5 }
  0x98   : > { %v336_v18 = vrot.slane %v325_v16, 4  ;;  %v348_v19 = vrot.slane %v327_v17, 4  ;;  %v350_v20 = vrot.slane %v323_v13, 4  ;;  %v361_v21 = vsel %vm224_vm0, %v360_v10, %v329_v9 }
  0x99   : > { %v367_v22 = vperm.slane %v361_v21, %v4131_v12  ;;  %v372_v23 = vrot.slane %v335_v14, 4  ;;  %v338_v24 = vrot.slane %v321_v4, 4  ;;  %v363_v25 = vsel %vm224_vm0, %v333_v7, %v362_v15 }
  0x9a   : > { %v337_v26 = vsel %vm224_vm0, %v336_v18, %v321_v4  ;;  %v349_v27 = vsel %vm224_vm0, %v348_v19, %v323_v13  ;;  %v351_v28 = vsel %vm224_vm0, %v327_v17, %v350_v20  ;;  %v371_v29 = vperm.slane %v363_v25, %v4131_v12 }
  0x9b   : > { %v343_v30 = vperm.slane %v337_v26, %v4131_v12  ;;  %v355_v31 = vperm.slane %v349_v27, %v4131_v12  ;;  %v373_v32 = vsel %vm224_vm0, %v372_v23, %v331_v6  ;;  %v410_v34 = vrot.slane %v367_v22, 4 }
  0x9c   : > { %v379_v35 = vperm.slane %v373_v32, %v4131_v12  ;;  %v339_v36 = vsel %vm224_vm0, %v325_v16, %v338_v24  ;;  %v359_v37 = vperm.slane %v351_v28, %v4131_v12  ;;  %v375_v38 = vsel %vm224_vm0, %v335_v14, %v374_v11 }
  0x9d   : > { %v386_v39 = vrot.slane %v343_v30, 4  ;;  %v384_v40 = vrot.slane %v355_v31, 4  ;;  %v383_v41 = vperm.slane %v375_v38, %v4131_v12  ;;  %v347_v44 = vperm.slane %v339_v36, %v4131_v12 }
  0x9e   : > { %v411_v42 = vsel %vm224_vm0, %v379_v35, %v410_v34  ;;  %v408_v43 = vrot.slane %v379_v35, 4  ;;  %v396_v45 = vrot.slane %v359_v37, 4  ;;  %v422_v53 = vrot.slane %v371_v29, 4 }
  0x9f   : > { %v387_v46 = vsel %vm224_vm0, %v355_v31, %v386_v39  ;;  %v419_v47 = vperm.slane %v411_v42, %v4142_v33  ;;  %v385_v48 = vsel %vm224_vm0, %v384_v40, %v343_v30  ;;  %v420_v49 = vrot.slane %v383_v41, 4 }
  0xa0   : > { %v391_v50 = vperm.slane %v385_v48, %v4142_v33  ;;  %v409_v51 = vsel %vm224_vm0, %v408_v43, %v367_v22  ;;  %v397_v52 = vsel %vm224_vm0, %v396_v45, %v347_v44  ;;  %v395_v54 = vperm.slane %v387_v46, %v4142_v33 }
  0xa1   : > { %v436_v55 = vrot.slane %v419_v47, 4  ;;  %v415_v56 = vperm.slane %v409_v51, %v4142_v33  ;;  %v421_v57 = vsel %vm224_vm0, %v420_v49, %v371_v29  ;;  %v403_v59 = vperm.slane %v397_v52, %v4142_v33 }
  0xa2   : > { %v434_v58 = vrot.slane %v391_v50, 4  ;;  %v398_v60 = vrot.slane %v347_v44, 4  ;;  %v427_v63 = vperm.slane %v421_v57, %v4142_v33  ;;  %v423_v2 = vsel %vm224_vm0, %v383_v41, %v422_v53 }
  0xa3   : > { %v437_v61 = vsel %vm224_vm0, %v436_v55, %v395_v54  ;;  %v432_v62 = vrot.slane %v415_v56, 4  ;;  %v438_v5 = vrot.slane %v395_v54, 4  ;;  %v442_v7 = vrot.slane %v403_v59, 4 }
  0xa4   : > { %v455_v0 = vsel %vm448_vm1, %v437_v61, 0.0  ;;  %v435_v1 = vsel %vm224_vm0, %v415_v56, %v434_v58  ;;  %v399_v8 = vsel %vm224_vm0, %v359_v37, %v398_v60  ;;  %v440_v9 = vrot.slane %v427_v63, 4 }
  0xa5   : > { %456 = vadd.xlane.f32.xlu2 %v455_v0  ;;  %v433_v3 = vsel %vm224_vm0, %v432_v62, %v391_v50  ;;  %v452_v4 = vsel %vm448_vm1, %v435_v1, 0.0  ;;  %v407_v10 = vperm.slane %v399_v8, %v4142_v33  ;;  %v431_v11 = vperm.slane %v423_v2, %v4142_v33 }
  0xa6   : > { %v449_v6 = vsel %vm448_vm1, %v433_v3, 0.0  ;;  %453 = vadd.xlane.f32.xlu1 %v452_v4  ;;  %v439_v13 = vsel %vm224_vm0, %v419_v47, %v438_v5  ;;  %v443_v15 = vsel %vm224_vm0, %v427_v63, %v442_v7  ;;  %v441_v16 = vsel %vm224_vm0, %v440_v9, %v403_v59  ;;  %v635_v4 = vld [vmem:[%s5262_s1 + $0x18] sm:$0xff]  ;;  %v634_v5 = vld [vmem:[%s5262_s1 + $0x10] sm:$0xff]  ;;  %v632_v7 = vld [vmem:[%s5262_s1] sm:$0xff] }
  0xa7   : > { %450 = vadd.xlane.f32.xlu0 %v449_v6  ;;  %v446_v14 = vrot.slane %v407_v10, 4  ;;  %v458_v18 = vsel %vm448_vm1, %v439_v13, 0.0  ;;  %v464_v19 = vsel %vm448_vm1, %v443_v15, 0.0  ;;  %v461_v20 = vsel %vm448_vm1, %v441_v16, 0.0  ;;  %676 = vmatpush.msra.mxu0 %v635_v4  ;;  %v633_v6 = vld [vmem:[%s5262_s1 + $0x8] sm:$0xff] }
  0xa8   : > { %v444_v21 = vrot.slane %v431_v11, 4  ;;  %v4073_v24 = vmov 32.0  }
  0xa9   : > { %v4216_v17 = vsel %vm224_vm0, %v431_v11, %v446_v14  ;;  %3882 = vrcp.f32 %v4073_v24  ;;  %677 = vmatpush.msra.mxu0 %v634_v5 }
  0xaa   : > { %v445_v22 = vsel %vm224_vm0, %v444_v21, %v407_v10  ;;  %v470_v60 = vsel %vm448_vm1, %v4216_v17, 0.0 }
  0xab   : > { %v467_v23 = vsel %vm448_vm1, %v445_v22, 0.0  ;;  %678 = vmatpush.msra.mxu0 %v633_v6 }
  0xad   : > { %459 = vadd.xlane.f32.xlu2 %v458_v18  ;;  %679 = vmatpush.msra.mxu0 %v632_v7 }
  0xae   : > { %465 = vadd.xlane.f32.xlu1 %v464_v19 }
  0xaf   : > { %462 = vadd.xlane.f32.xlu0 %v461_v20  ;;  %v3883_v25 = vpop.eup %3882 }
  0xb0   : > { %v474_v26 = vmul.f32 32.0, %v3883_v25  ;;  %vm478_vm2 = vweird.f32 %v3883_v25 }
  0xb2   : > { %v475_v27 = vsub.f32 1.0, %v474_v26 }
  0xb4   : > { %v476_v28 = vmul.f32 %v3883_v25, %v475_v27 }
  0xb6   : > { %v477_v29 = vadd.f32 %v3883_v25, %v476_v28 }
  0xb7   : > { %468 = vadd.xlane.f32.xlu0 %v467_v23 }
  0xb8   : > { %v4223_v30 = vsel %vm478_vm2, %v3883_v25, %v477_v29 }
 0x118   : > { %v457_v31 = vpop.xlane.xlu2 %456 }
 0x119   : > { %v482_v32 = vmul.f32 %v4223_v30, %v457_v31  ;;  %v454_v34 = vpop.xlane.xlu1 %453 }
 0x11a   : > { %v451_v35 = vpop.xlane.xlu0 %450  ;;  %v481_v36 = vmul.f32 %v4223_v30, %v454_v34 }
 0x11b   : > { %v4227_v37 = vsub.f32 %v437_v61, %v482_v32  ;;  %v480_v38 = vmul.f32 %v4223_v30, %v451_v35 }
 0x11c   : > { %v4230_v39 = vsub.f32 %v435_v1, %v481_v36 }
 0x11d   : > { %v4232_v40 = vsub.f32 %v433_v3, %v480_v38  ;;  %v498_v41 = vmul.f32 %v4227_v37, %v4227_v37 }
 0x11e   : > { %v497_v42 = vmul.f32 %v4230_v39, %v4230_v39 }
 0x11f   : > { %v510_v43 = vsel %vm448_vm1, %v498_v41, 0.0  ;;  %v496_v44 = vmul.f32 %v4232_v40, %v4232_v40 }
 0x120   : > { %v460_v45 = vpop.xlane.xlu2 %459  ;;  %511 = vadd.xlane.f32.xlu0 %v510_v43  ;;  %v507_v46 = vsel %vm448_vm1, %v497_v42, 0.0 }
 0x121   : > { %v483_v47 = vmul.f32 %v4223_v30, %v460_v45  ;;  %v504_v48 = vsel %vm448_vm1, %v496_v44, 0.0  ;;  %508 = vadd.xlane.f32.xlu1 %v507_v46  ;;  %v466_v49 = vpop.xlane.xlu1 %465 }
 0x122   : > { %505 = vadd.xlane.f32.xlu2 %v504_v48  ;;  %v463_v50 = vpop.xlane.xlu0 %462  ;;  %v485_v51 = vmul.f32 %v4223_v30, %v466_v49 }
 0x123   : > { %v4245_v52 = vsub.f32 %v439_v13, %v483_v47  ;;  %v484_v54 = vmul.f32 %v4223_v30, %v463_v50 }
 0x124   : > { %v4247_v53 = vsub.f32 %v443_v15, %v485_v51 }
 0x125   : > { %v499_v55 = vmul.f32 %v4245_v52, %v4245_v52  ;;  %v4256_v59 = vsub.f32 %v441_v16, %v484_v54 }
 0x126   : > { %v501_v56 = vmul.f32 %v4247_v53, %v4247_v53 }
 0x127   : > { %v513_v57 = vsel %vm448_vm1, %v499_v55, 0.0  ;;  %v500_v0 = vmul.f32 %v4256_v59, %v4256_v59 }
 0x128   : > { %v519_v58 = vsel %vm448_vm1, %v501_v56, 0.0 }
 0x129   : > { %514 = vadd.xlane.f32.xlu1 %v513_v57  ;;  %520 = vadd.xlane.f32.xlu0 %v519_v58  ;;  %v516_v2 = vsel %vm448_vm1, %v500_v0, 0.0 }
 0x12a   : > { %471 = vadd.xlane.f32.xlu2 %v470_v60  ;;  %v469_v61 = vpop.xlane.xlu0 %468 }
 0x12b   : > { %v486_v62 = vmul.f32 %v4223_v30, %v469_v61 }
 0x12d   : > { %v4261_v63 = vsub.f32 %v445_v22, %v486_v62 }
 0x12f   : > { %v502_v1 = vmul.f32 %v4261_v63, %v4261_v63 }
 0x131   : > { %v522_v3 = vsel %vm448_vm1, %v502_v1, 0.0 }
 0x132   : > { %517 = vadd.xlane.f32.xlu2 %v516_v2  ;;  %523 = vadd.xlane.f32.xlu1 %v522_v3 }
 0x193   : > { %v512_v8 = vpop.xlane.xlu0 %511 }
 0x194   : > { %v530_v9 = vmul.f32 %v512_v8, %v4223_v30  ;;  %v509_v10 = vpop.xlane.xlu1 %508 }
 0x195   : > { %v506_v11 = vpop.xlane.xlu2 %505  ;;  %v529_v13 = vmul.f32 %v509_v10, %v4223_v30 }
 0x196   : > { %v528_v14 = vmul.f32 %v506_v11, %v4223_v30  ;;  %v4284_v18 = vadd.f32 1e-05, %v530_v9 }
 0x197   : > { %v537_v15 = vadd.f32 1e-05, %v529_v13 }
 0x198   : > { %v536_v16 = vadd.f32 1e-05, %v528_v14  ;;  %vm570_vm10 = vweird.f32 %v4284_v18 }
 0x199   : > { %3884 = vrsqrt.f32 %v537_v15  ;;  %vm560_vm7 = vweird.f32 %v537_v15 }
 0x19a   : > { %3886 = vrsqrt.f32 %v536_v16  ;;  %vm550_vm4 = vweird.f32 %v536_v16 }
 0x19b   : > { %3888 = vrsqrt.f32 %v4284_v18 }
 0x19c   : > { %v515_v19 = vpop.xlane.xlu1 %514  ;;  %v521_v47 = vpop.xlane.xlu0 %520 }
 0x19d   : > { %v472_v20 = vpop.xlane.xlu2 %471  ;;  %v531_v21 = vmul.f32 %v515_v19, %v4223_v30  ;;  %v533_v51 = vmul.f32 %v521_v47, %v4223_v30 }
 0x19e   : > { %v487_v22 = vmul.f32 %v4223_v30, %v472_v20 }
 0x19f   : > { %v3885_v23 = vpop.eup %3884  ;;  %v4292_v27 = vadd.f32 1e-05, %v531_v21  ;;  %v541_v58 = vadd.f32 1e-05, %v533_v51 }
 0x1a0   : > { %v3887_v24 = vpop.eup %3886  ;;  %v555_v25 = vmul.f32 %v3885_v23, %v537_v15  ;;  %v4290_v26 = vsub.f32 %v4216_v17, %v487_v22  ;;  %vm561_vm6 = vweird.f32 %v3885_v23 }
 0x1a1   : > { %v545_v28 = vmul.f32 %v3887_v24, %v536_v16  ;;  %v3889_v29 = vpop.eup %3888  ;;  %3890 = vrsqrt.f32 %v4292_v27  ;;  %vm551_vm3 = vweird.f32 %v3887_v24  ;;  %vm562_vm8 = vmor %vm560_vm7, %vm561_vm6  ;;  %vm580_vm13 = vweird.f32 %v4292_v27 }
 0x1a2   : > { %v556_v31 = vmul.f32 %v3885_v23, %v555_v25  ;;  %v503_v32 = vmul.f32 %v4290_v26, %v4290_v26  ;;  %v565_v38 = vmul.f32 %v3889_v29, %v4284_v18  ;;  %vm552_vm5 = vmor %vm550_vm4, %vm551_vm3  ;;  %vm571_vm9 = vweird.f32 %v3889_v29 }
 0x1a3   : > { %v546_v34 = vmul.f32 %v3887_v24, %v545_v28  ;;  %vm572_vm11 = vmor %vm570_vm10, %vm571_vm9 }
 0x1a4   : > { %v525_v35 = vsel %vm448_vm1, %v503_v32, 0.0  ;;  %v557_v41 = vmul.f32 0.5, %v556_v31  ;;  %v566_v45 = vmul.f32 %v3889_v29, %v565_v38 }
 0x1a5   : > { %v547_v36 = vmul.f32 0.5, %v546_v34  ;;  %526 = vadd.xlane.f32.xlu2 %v525_v35  ;;  %v518_v17 = vpop.xlane.xlu2 %517  ;;  %v524_v62 = vpop.xlane.xlu1 %523 }
 0x1a6   : > { %v532_v42 = vmul.f32 %v518_v17, %v4223_v30  ;;  %v558_v46 = vsub.f32 1.5, %v557_v41  ;;  %v567_v55 = vmul.f32 0.5, %v566_v45  ;;  %v534_v2 = vmul.f32 %v524_v62, %v4223_v30 }
 0x1a7   : > { %v548_v43 = vsub.f32 1.5, %v547_v36  ;;  %v3891_v49 = vpop.eup %3890 }
 0x1a8   : > { %v540_v44 = vadd.f32 1e-05, %v532_v42  ;;  %v575_v56 = vmul.f32 %v3891_v49, %v4292_v27  ;;  %v559_v57 = vmul.f32 %v3885_v23, %v558_v46  ;;  %v568_v60 = vsub.f32 1.5, %v567_v55 }
 0x1a9   : > { %v549_v48 = vmul.f32 %v3887_v24, %v548_v43  ;;  %v542_v6 = vadd.f32 1e-05, %v534_v2  ;;  %vm581_vm12 = vweird.f32 %v3891_v49 }
 0x1aa   : > { %3892 = vrsqrt.f32 %v540_v44  ;;  %v576_v61 = vmul.f32 %v3891_v49, %v575_v56  ;;  %v563_v0 = vsel %vm562_vm8, %v3885_v23, %v559_v57  ;;  %v569_v5 = vmul.f32 %v3889_v29, %v568_v60  ;;  %vm582_vm14 = vmor %vm580_vm13, %vm581_vm12 }
 0x1ab   : > { %v553_v50 = vsel %vm552_vm5, %v3887_v24, %v549_v48  ;;  %3894 = vrsqrt.f32 %v541_v58  ;;  %vm590_vm2 = vweird.f32 %v540_v44  ;;  %vm600_vm5 = vweird.f32 %v541_v58 }
 0x1ac   : > { %v624_v54 = vmul.f32 %v553_v50, %v4232_v40  ;;  %v625_v40 = vmul.f32 %v563_v0, %v4230_v39  ;;  %v577_v3 = vmul.f32 0.5, %v576_v61  ;;  %v573_v9 = vsel %vm572_vm11, %v3889_v29, %v569_v5 }
 0x1ad   : > { %3896 = vrsqrt.f32 %v542_v6  ;;  %v626_v11 = vmul.f32 %v573_v9, %v4227_v37  ;;  %vm610_vm8 = vweird.f32 %v542_v6  ;;  %vm860_vm13 = vcmask 64512  }
 0x1ae   : > { %3653 = vmatmul.msk.f32.vlgmr.msra.gmra.mxu0 %vm448_vm1, %v624_v54  ;;  %v578_v7 = vsub.f32 1.5, %v577_v3 }
 0x1b0   : > { %v3893_v1 = vpop.eup %3892  ;;  %v579_v39 = vmul.f32 %v3891_v49, %v578_v7 }
 0x1b1   : > { %v585_v4 = vmul.f32 %v3893_v1, %v540_v44  ;;  %v3895_v10 = vpop.eup %3894  ;;  %vm591_vm15 = vweird.f32 %v3893_v1  ;;  %v3881_v44 = vld [vmem:[%s5263_s2] ss:$0 sm:$0xff] }
 0x1b2   : > { %v595_v13 = vmul.f32 %v3895_v10, %v541_v58  ;;  %v583_v18 = vsel %vm582_vm14, %v3891_v49, %v579_v39  ;;  %vm592_vm3 = vmor %vm590_vm2, %vm591_vm15  ;;  %vm601_vm4 = vweird.f32 %v3895_v10 }
 0x1b3   : > { %v586_v8 = vmul.f32 %v3893_v1, %v585_v4  ;;  %v3897_v19 = vpop.eup %3896  ;;  %v627_v20 = vmul.f32 %v583_v18, %v4245_v52  ;;  %vm602_vm6 = vmor %vm600_vm5, %vm601_vm4 }
 0x1b4   : > { %v596_v15 = vmul.f32 %v3895_v10, %v595_v13  ;;  %v605_v22 = vmul.f32 %v3897_v19, %v542_v6  ;;  %vm611_vm7 = vweird.f32 %v3897_v19 }
 0x1b5   : > { %v587_v14 = vmul.f32 0.5, %v586_v8  ;;  %vm612_vm9 = vmor %vm610_vm8, %vm611_vm7 }
 0x1b6   : > { %3654 = vmatmul.msk.f32.gmra.mxu0 %vm448_vm1, %v625_v40  ;;  %v597_v21 = vmul.f32 0.5, %v596_v15  ;;  %v606_v24 = vmul.f32 %v3897_v19, %v605_v22 }
 0x1b7   : > { %v588_v16 = vsub.f32 1.5, %v587_v14 }
 0x1b8   : > { %v598_v37 = vsub.f32 1.5, %v597_v21  ;;  %v607_v28 = vmul.f32 0.5, %v606_v24 }
 0x1b9   : > { %v589_v23 = vmul.f32 %v3893_v1, %v588_v16 }
 0x1ba   : > { %v599_v29 = vmul.f32 %v3895_v10, %v598_v37  ;;  %v608_v52 = vsub.f32 1.5, %v607_v28 }
 0x1bb   : > { %v593_v25 = vsel %vm592_vm3, %v3893_v1, %v589_v23 }
 0x1bc   : > { %v628_v27 = vmul.f32 %v593_v25, %v4256_v59  ;;  %v603_v31 = vsel %vm602_vm6, %v3895_v10, %v599_v29  ;;  %v609_v34 = vmul.f32 %v3897_v19, %v608_v52 }
 0x1bd   : > { %v629_v32 = vmul.f32 %v603_v31, %v4247_v53 }
 0x1be   : > { %3655 = vmatmul.msk.f32.gmra.mxu0 %vm448_vm1, %v626_v11  ;;  %v613_v35 = vsel %vm612_vm9, %v3897_v19, %v609_v34 }
 0x1bf   : > { %v630_v59 = vmul.f32 %v613_v35, %v4261_v63 }
 0x1c6   : > { %3656 = vmatmul.msk.f32.gmra.mxu0 %vm448_vm1, %v627_v20 }
 0x1ce   : > { %3657 = vmatmul.msk.f32.gmra.mxu0 %vm448_vm1, %v628_v27 }
 0x1d6   : > { %3658 = vmatmul.msk.f32.gmra.mxu0 %vm448_vm1, %v629_v32 }
 0x1de   : > { %3659 = vmatmul.msk.f32.gmra.mxu0 %vm448_vm1, %v630_v59 }
 0x218   : > { %v527_v36 = vpop.xlane.xlu2 %526 }
 0x219   : > { %v535_v38 = vmul.f32 %v527_v36, %v4223_v30 }
 0x21b   : > { %v543_v41 = vadd.f32 1e-05, %v535_v38 }
 0x21d   : > { %3898 = vrsqrt.f32 %v543_v41  ;;  %vm620_vm11 = vweird.f32 %v543_v41 }
 0x223   : > { %v3899_v17 = vpop.eup %3898 }
 0x224   : > { %v615_v42 = vmul.f32 %v3899_v17, %v543_v41  ;;  %vm621_vm10 = vweird.f32 %v3899_v17 }
 0x225   : > { %vm622_vm12 = vmor %vm620_vm11, %vm621_vm10 }
 0x226   : > { %v616_v43 = vmul.f32 %v3899_v17, %v615_v42 }
 0x228   : > { %v617_v53 = vmul.f32 0.5, %v616_v43 }
 0x22a   : > { %v618_v45 = vsub.f32 1.5, %v617_v53 }
 0x22b   : > { %v681_v46 = vpop.f32.mrf.mxu0 }
 0x22c   : > { %v4323_v63 = vadd.f32 %v3881_v44, %v681_v46  ;;  %v619_v47 = vmul.f32 %v3899_v17, %v618_v45 }
 0x22e   : > { %858 = vrot.lane.b32.xlu1 %v4323_v63, %s4069_s23  ;;  %v623_v30 = vsel %vm622_vm12, %v3899_v17, %v619_v47 }
 0x22f   : > { %v631_v48 = vmul.f32 %v623_v30, %v4290_v26 }
 0x231   : > { %3660 = vmatmul.msk.f32.gmra.mxu0 %vm448_vm1, %v631_v48 }
 0x233   : > { %v684_v49 = vpop.f32.mrf.mxu0 }
 0x234   : > { %v4333_v55 = vadd.f32 %v3881_v44, %v684_v49 }
 0x23b   : > { %v687_v50 = vpop.f32.mrf.mxu0 }
 0x23c   : > { %v4329_v51 = vadd.f32 %v3881_v44, %v687_v50 }
 0x23e   : > { %913 = vrot.lane.b32.xlu0 %v4329_v51, %s4069_s23  ;;  %v4349_v61 = vpack.i.bf16 %v4333_v55, %v4329_v51 }
 0x243   : > { %v690_v54 = vpop.f32.mrf.mxu0 }
 0x244   : > { %v4337_v57 = vadd.f32 %v3881_v44, %v690_v54 }
 0x246   : > { %886 = vrot.lane.b32.xlu0 %v4333_v55, %s4069_s23 }
 0x24b   : > { %v693_v56 = vpop.f32.mrf.mxu0 }
 0x24c   : > { %v4339_v58 = vadd.f32 %v3881_v44, %v693_v56 }
 0x24e   : > { %967 = vrot.lane.b32.xlu1 %v4339_v58, %s4069_s23  ;;  %940 = vrot.lane.b32.xlu0 %v4337_v57, %s4069_s23  ;;  %v3816_v1 = vpack.i.bf16 %v4337_v57, %v4339_v58 }
 0x253   : > { %v696_v26 = vpop.f32.mrf.mxu0 }
 0x254   : > { %v4345_v60 = vadd.f32 %v3881_v44, %v696_v26 }
 0x256   : > { %3807 = vrot.lane.b32.xlu0 %v4349_v61, %s4070_s24  ;;  %994 = vrot.lane.b32.xlu2 %v4345_v60, %s4069_s23  ;;  %v3811_v7 = vpack.i.bf16 %v4345_v60, %v4323_v63 }
 0x25b   : > { %v699_v62 = vpop.f32.mrf.mxu0 }
 0x25c   : > { %v4355_v0 = vadd.f32 %v3881_v44, %v699_v62 }
 0x25e   : > { %1480 = vrot.lane.b32.xlu0 %v4333_v55, %s4074_s9  ;;  %1021 = vrot.lane.b32.xlu1 %v4355_v0, %s4069_s23 }
 0x266   : > { %3817 = vrot.lane.b32.xlu1 %v3816_v1, %s4070_s24 }
 0x26e   : > { %1534 = vrot.lane.b32.xlu1 %v4337_v57, %s4075_s10 }
 0x276   : > { %1620 = vrot.lane.b32.xlu1 %v4355_v0, %s4074_s9 }
 0x27e   : > { %1478 = vrot.lane.b32.xlu1 %v4333_v55, %s4075_s10 }
 0x2a0   : > { %v859_v2 = vpop.permute.xlu1 %858 }
 0x2a1   : > { %3669 = vmatpush.xpose.msk.msrb.mxu0 %vm860_vm13, %v859_v2 }
 0x2a4   : > { %3670 = vmatmul.msk.f32.vlgmr.msrb.gmra.mxu0 %vm860_vm13, %v4323_v63 }
 0x2ae   : > { %v702_v40 = vpop.f32.mrf.mxu0 }
 0x2af   : > { %v4373_v3 = vadd.f32 %v3881_v44, %v702_v40 }
 0x2b0   : > { %v995_v4 = vpop.permute.xlu2 %994  ;;  %v914_v5 = vpop.permute.xlu0 %913 }
 0x2b1   : > { %1048 = vrot.lane.b32.xlu2 %v4373_v3, %s4069_s23  ;;  %3673 = vmatpush.xpose.msk.msra.mxu3 %vm860_vm13, %v914_v5  ;;  %v3821_v6 = vpack.i.bf16 %v4355_v0, %v4373_v3 }
 0x2b3   : > { %3822 = vrot.lane.b32.xlu1 %v3821_v6, %s4070_s24 }
 0x2b4   : > { %3674 = vmatmul.msk.f32.vlgmr.msra.gmra.mxu3 %vm860_vm13, %v4329_v51 }
 0x2b5   : > { %3679 = vmatpush.xpose.msk.msrb.mxu3 %vm860_vm13, %v995_v4 }
 0x2b8   : > { %v887_v8 = vpop.permute.xlu0 %886 }
 0x2b9   : > { %3812 = vrot.lane.b32.xlu2 %v3811_v7, %s4070_s24  ;;  %3671 = vmatpush.xpose.msk.msra.mxu0 %vm860_vm13, %v887_v8 }
 0x2bc   : > { %3672 = vmatmul.msk.f32.vlgmr.msra.gmra.mxu0 %vm860_vm13, %v4333_v55  ;;  %3680 = vmatmul.msk.f32.vlgmr.msrb.gmra.mxu3 %vm860_vm13, %v4345_v60 }
 0x2c0   : > { %v968_v9 = vpop.permute.xlu1 %967  ;;  %v941_v10 = vpop.permute.xlu0 %940 }
 0x2c1   : > { %3677 = vmatpush.xpose.msk.msra.mxu2 %vm860_vm13, %v968_v9  ;;  %1452 = vrot.lane.b32.xlu2 %v4323_v63, %s4074_s9 }
 0x2c2   : > { %3675 = vmatpush.xpose.msk.msra.mxu1 %vm860_vm13, %v941_v10 }
 0x2c4   : > { %3678 = vmatmul.msk.f32.vlgmr.msra.gmra.mxu2 %vm860_vm13, %v4339_v58 }
 0x2c5   : > { %3676 = vmatmul.msk.f32.vlgmr.msra.gmra.mxu1 %vm860_vm13, %v4337_v57 }
 0x2c8   : > { %v3808_v11 = vpop.permute.xlu0 %3807 }
 0x2c9   : > { %1450 = vrot.lane.b32.xlu2 %v4323_v63, %s4075_s10  ;;  %v3810_v13 = vunpack.i.h.bf16 %v3808_v11  ;;  %v3809_v16 = vunpack.i.l.bf16 %v3808_v11 }
 0x2d0   : > { %v1022_v14 = vpop.permute.xlu1 %1021  ;;  %v4453_v26 = vpop.permute.xlu0 %1480 }
 0x2d1   : > { %1536 = vrot.lane.b32.xlu2 %v4337_v57, %s4074_s9  ;;  %3681 = vmatpush.xpose.msk.msrb.mxu1 %vm860_vm13, %v1022_v14 }
 0x2d4   : > { %3682 = vmatmul.msk.f32.vlgmr.msrb.gmra.mxu1 %vm860_vm13, %v4355_v0 }
 0x2d5   : > { %1209 = vmatpush.msra.mxu1 %v3810_v13 }
 0x2d8   : > { %v3818_v39 = vpop.permute.xlu1 %3817 }
 0x2d9   : > { %v3819_v15 = vunpack.i.l.bf16 %v3818_v39  ;;  %1508 = vrot.lane.b32.xlu2 %v4329_v51, %s4074_s9  ;;  %v3820_v22 = vunpack.i.h.bf16 %v3818_v39 }
 0x2db   : > { %1287 = vmatpush.msrb.mxu1 %v3819_v15 }
 0x2e0   : > { %v4427_v38 = vpop.permute.xlu1 %1534 }
 0x2e1   : > { %1506 = vrot.lane.b32.xlu2 %v4329_v51, %s4075_s10 }
 0x2e8   : > { %v4431_v17 = vpop.permute.xlu1 %1620 }
 0x2e9   : > { %1618 = vrot.lane.b32.xlu2 %v4355_v0, %s4075_s10 }
 0x2f0   : > { %v4435_v43 = vpop.permute.xlu1 %1478 }
 0x30b   : > { %v1049_v18 = vpop.permute.xlu2 %1048 }
 0x30c   : > { %3683 = vmatpush.xpose.msk.msrb.mxu2 %vm860_vm13, %v1049_v18 }
 0x30f   : > { %3684 = vmatmul.msk.f32.vlgmr.msrb.gmra.mxu2 %vm860_vm13, %v4373_v3 }
 0x310   : > { %1235 = vmatpush.msra.mxu2 %v3809_v16 }
 0x313   : > { %v3813_v19 = vpop.permute.xlu2 %3812 }
 0x314   : > { %v3815_v20 = vunpack.i.h.bf16 %v3813_v19  ;;  %v3814_v21 = vunpack.i.l.bf16 %v3813_v19 }
 0x316   : > { %1183 = vmatpush.msra.mxu3 %v3814_v21  ;;  %1313 = vmatpush.msrb.mxu2 %v3815_v20 }
 0x318   : > { %1261 = vmatpush.msrb.mxu3 %v3820_v22 }
 0x31b   : > { %v4429_v41 = vpop.permute.xlu2 %1452 }
 0x321   : > { %v882_v23 = vpop.f32.mrf.mxu0 }
 0x322   : > { %v1074_v37 = vsel %vm860_vm13, %v882_v23, -inf }
 0x323   : > { %1075 = vmax.xlane.f32.xlu1 %v1074_v37  ;;  %v4433_v42 = vpop.permute.xlu2 %1450 }
 0x325   : > { %v4437_v53 = vpop.permute.xlu1 %3822 }
 0x32b   : > { %v4439_v44 = vpop.permute.xlu2 %1536 }
 0x333   : > { %v4445_v48 = vpop.permute.xlu2 %1508 }
 0x337   : > { %v936_v24 = vpop.f32.mrf.mxu3 }
 0x338   : > { %v1080_v25 = vsel %vm860_vm13, %v936_v24, -inf }
 0x339   : > { %1081 = vmax.xlane.f32.xlu0 %v1080_v25  ;;  %v909_v27 = vpop.f32.mrf.mxu0 }
 0x33a   : > { %v1077_v28 = vsel %vm860_vm13, %v909_v27, -inf }
 0x33b   : > { %1078 = vmax.xlane.f32.xlu2 %v1077_v28  ;;  %v4449_v54 = vpop.permute.xlu2 %1506 }
 0x33f   : > { %v1017_v29 = vpop.f32.mrf.mxu3 }
 0x340   : > { %v1089_v52 = vsel %vm860_vm13, %v1017_v29, -inf }
 0x341   : > { %1090 = vmax.xlane.f32.xlu0 %v1089_v52 }
 0x342   : > { %v963_v31 = vpop.f32.mrf.mxu1 }
 0x343   : > { %v1083_v32 = vsel %vm860_vm13, %v963_v31, -inf  ;;  %v4457_v62 = vpop.permute.xlu2 %1618 }
 0x344   : > { %1084 = vmax.xlane.f32.xlu1 %v1083_v32  ;;  %v3831_v32 = vpack.i.bf16 %v4345_v60, %v4355_v0 }
 0x347   : > { %v990_v34 = vpop.f32.mrf.mxu2 }
 0x348   : > { %v1086_v35 = vsel %vm860_vm13, %v990_v34, -inf }
 0x349   : > { %1087 = vmax.xlane.f32.xlu2 %v1086_v35 }
 0x351   : > { %v1044_v59 = vpop.f32.mrf.mxu1 }
 0x352   : > { %v1092_v36 = vsel %vm860_vm13, %v1044_v59, -inf }
 0x353   : > { %1093 = vmax.xlane.f32.xlu2 %v1092_v36 }
 0x35d   : > { %1564 = vrot.lane.b32.xlu1 %v4339_v58, %s4074_s9 }
 0x36b   : > { %1592 = vrot.lane.b32.xlu2 %v4345_v60, %s4074_s9 }
 0x392   : > { %v4441_v45 = vpop.f32.mrf.mxu2 }
 0x393   : > { %v1095_v46 = vsel %vm860_vm13, %v4441_v45, -inf }
 0x394   : > { %1096 = vmax.xlane.f32.xlu0 %v1095_v46 }
 0x396   : > { %v1076_v47 = vpop.xlane.xlu1 %1075 }
 0x397   : > { %v1098_v30 = vsub.f32 %v882_v23, %v1076_v47 }
 0x399   : > { %v1106_v49 = vmul.f32 1.442695, %v1098_v30 }
 0x39b   : > { %3900 = vpow2.f32 %v1106_v49 }
 0x3a1   : > { %v4447_v50 = vpop.eup %3900 }
 0x3a2   : > { %v1122_v56 = vsel %vm860_vm13, %v4447_v50, 0.0 }
 0x3a3   : > { %1123 = vadd.xlane.f32.xlu2 %v1122_v56 }
 0x3a8   : > { %1562 = vrot.lane.b32.xlu0 %v4339_v58, %s4075_s10 }
 0x3ac   : > { %v1082_v1 = vpop.xlane.xlu0 %1081 }
 0x3ad   : > { %v1100_v2 = vsub.f32 %v936_v24, %v1082_v1 }
 0x3ae   : > { %v1079_v4 = vpop.xlane.xlu2 %1078 }
 0x3af   : > { %v1110_v40 = vmul.f32 1.442695, %v1100_v2  ;;  %v1099_v16 = vsub.f32 %v909_v27, %v1079_v4  ;;  %v3836_v4 = vpack.i.bf16 %v4337_v57, %v4323_v63 }
 0x3b1   : > { %3902 = vpow2.f32 %v1110_v40  ;;  %v1108_v20 = vmul.f32 1.442695, %v1099_v16  ;;  %v3824_v16 = vunpack.i.l.bf16 %v4437_v53 }
 0x3b4   : > { %v1091_v6 = vpop.xlane.xlu0 %1090 }
 0x3b5   : > { %v1103_v10 = vsub.f32 %v1017_v29, %v1091_v6 }
 0x3b7   : > { %v4459_v5 = vpop.eup %3902  ;;  %v1085_v7 = vpop.xlane.xlu1 %1084  ;;  %v1116_v39 = vmul.f32 1.442695, %v1103_v10 }
 0x3b8   : > { %v1101_v8 = vsub.f32 %v963_v31, %v1085_v7  ;;  %v1128_v9 = vsel %vm860_vm13, %v4459_v5, 0.0 }
 0x3b9   : > { %1129 = vadd.xlane.f32.xlu1 %v1128_v9 }
 0x3ba   : > { %v1112_v11 = vmul.f32 1.442695, %v1101_v8 }
 0x3bc   : > { %3904 = vpow2.f32 %v1112_v11  ;;  %v1088_v13 = vpop.xlane.xlu2 %1087 }
 0x3bd   : > { %v1102_v14 = vsub.f32 %v990_v34, %v1088_v13 }
 0x3bf   : > { %v1114_v15 = vmul.f32 1.442695, %v1102_v14 }
 0x3c1   : > { %3906 = vpow2.f32 %v1114_v15 }
 0x3c2   : > { %v4463_v18 = vpop.eup %3904  ;;  %3908 = vpow2.f32 %v1116_v39 }
 0x3c3   : > { %v1131_v19 = vsel %vm860_vm13, %v4463_v18, 0.0  ;;  %3910 = vpow2.f32 %v1108_v20 }
 0x3c4   : > { %1132 = vadd.xlane.f32.xlu1 %v1131_v19 }
 0x3c6   : > { %v1094_v21 = vpop.xlane.xlu2 %1093 }
 0x3c7   : > { %v4467_v22 = vpop.eup %3906  ;;  %v1104_v37 = vsub.f32 %v1044_v59, %v1094_v21 }
 0x3c8   : > { %v4469_v23 = vpop.eup %3908  ;;  %v1134_v24 = vsel %vm860_vm13, %v4467_v22, 0.0 }
 0x3c9   : > { %1135 = vadd.xlane.f32.xlu2 %v1134_v24  ;;  %v1137_v25 = vsel %vm860_vm13, %v4469_v23, 0.0  ;;  %v1118_v27 = vmul.f32 1.442695, %v1104_v37  ;;  %v4475_v28 = vpop.eup %3910 }
 0x3ca   : > { %v1125_v29 = vsel %vm860_vm13, %v4475_v28, 0.0 }
 0x3cb   : > { %3912 = vpow2.f32 %v1118_v27 }
 0x3cc   : > { %1138 = vadd.xlane.f32.xlu1 %v1137_v25 }
 0x3ce   : > { %v4503_v36 = vpop.permute.xlu2 %1592 }
 0x3cf   : > { %v1565_v1 = vpop.permute.xlu1 %1564 }
 0x3d1   : > { %v4479_v52 = vpop.eup %3912 }
 0x3d2   : > { %1126 = vadd.xlane.f32.xlu0 %v1125_v29  ;;  %v1140_v31 = vsel %vm860_vm13, %v4479_v52, 0.0 }
 0x3da   : > { %1141 = vadd.xlane.f32.xlu0 %v1140_v31 }
 0x3e1   : > { %1646 = vrot.lane.b32.xlu2 %v4373_v3, %s4075_s10 }
 0x3e9   : > { %3832 = vrot.lane.b32.xlu2 %v3831_v32, %s4076_s11 }
 0x3ee   : > { %1648 = vrot.lane.b32.xlu0 %v4373_v3, %s4074_s9 }
 0x3f1   : > { %2107 = vrot.lane.b32.xlu2 %v4329_v51, %s4077_s12 }
 0x3f6   : > { %3827 = vrot.lane.b32.xlu0 %v4349_v61, %s4076_s11 }
 0x3f9   : > { %2081 = vrot.lane.b32.xlu2 %v4333_v55, %s4078_s13 }
 0x3fe   : > { %2109 = vrot.lane.b32.xlu0 %v4329_v51, %s4078_s13 }
 0x401   : > { %2079 = vrot.lane.b32.xlu2 %v4333_v55, %s4077_s12 }
 0x407   : > { %v1097_v34 = vpop.xlane.xlu0 %1096 }
 0x408   : > { %v1105_v35 = vsub.f32 %v4441_v45, %v1097_v34  ;;  %v3825_v45 = vunpack.i.h.bf16 %v4437_v53 }
 0x409   : > { %2219 = vrot.lane.b32.xlu2 %v4355_v0, %s4077_s12 }
 0x40a   : > { %v1120_v59 = vmul.f32 1.442695, %v1105_v35 }
 0x40c   : > { %3914 = vpow2.f32 %v1120_v59 }
 0x412   : > { %v4505_v46 = vpop.eup %3914 }
 0x413   : > { %v1143_v47 = vsel %vm860_vm13, %v4505_v46, 0.0 }
 0x414   : > { %1144 = vadd.xlane.f32.xlu1 %v1143_v47 }
 0x416   : > { %v1124_v30 = vpop.xlane.xlu2 %1123 }
 0x417   : > { %3916 = vrcp.f32 %v1124_v30 }
 0x41a   : > { %v1563_v7 = vpop.permute.xlu0 %1562 }
 0x41d   : > { %v3917_v49 = vpop.eup %3916 }
 0x41e   : > { %v1154_v56 = vmul.f32 %v3917_v49, %v4447_v50 }
 0x420   : > { %3685 = vmatmul.msk.f32.vlgmr.msra.gmra.mxu3 %vm860_vm13, %v1154_v56 }
 0x421   : > { %1339 = vmatpush.msra.mxu3 %v3825_v45 }
 0x42c   : > { %v1130_v2 = vpop.xlane.xlu1 %1129 }
 0x42d   : > { %3918 = vrcp.f32 %v1130_v2  ;;  %1590 = vrot.lane.b32.xlu1 %v4345_v60, %s4075_s10 }
 0x433   : > { %v3919_v40 = vpop.eup %3918 }
 0x434   : > { %v1156_v6 = vmul.f32 %v3919_v40, %v4459_v5  ;;  %v4529_v5 = vpack.i.bf16 %v4373_v3, %v4339_v58 }
 0x435   : > { %3837 = vrot.lane.b32.xlu1 %v3836_v4, %s4076_s11 }
 0x436   : > { %3687 = vmatmul.msk.f32.vlgmr.msra.gmra.mxu2 %vm860_vm13, %v1156_v6 }
 0x437   : > { %v1133_v50 = vpop.xlane.xlu1 %1132  ;;  %3693 = vmatpush.xpose.msk.msra.mxu2 %vm860_vm13, %v4429_v41 }
 0x438   : > { %3920 = vrcp.f32 %v1133_v50 }
 0x43c   : > { %v1136_v14 = vpop.xlane.xlu2 %1135 }
 0x43d   : > { %2221 = vrot.lane.b32.xlu1 %v4355_v0, %s4078_s13 }
 0x43e   : > { %v3921_v8 = vpop.eup %3920 }
 0x43f   : > { %v1157_v9 = vmul.f32 %v3921_v8, %v4463_v18  ;;  %v1139_v10 = vpop.xlane.xlu1 %1138 }
 0x440   : > { %3922 = vrcp.f32 %v1139_v10 }
 0x441   : > { %3688 = vmatmul.msk.f32.vlgmr.msrb.gmra.mxu3 %vm860_vm13, %v1157_v9 }
 0x442   : > { %3695 = vmatpush.xpose.msk.msrb.mxu3 %vm860_vm13, %v4453_v26 }
 0x445   : > { %3842 = vrot.lane.b32.xlu1 %v4529_v5, %s4076_s11  ;;  %v1127_v41 = vpop.xlane.xlu0 %1126 }
 0x446   : > { %v3923_v11 = vpop.eup %3922  ;;  %3924 = vrcp.f32 %v1127_v41 }
 0x447   : > { %v1159_v13 = vmul.f32 %v3923_v11, %v4469_v23  ;;  %3926 = vrcp.f32 %v1136_v14 }
 0x449   : > { %3690 = vmatmul.msk.f32.vlgmr.msrb.gmra.mxu2 %vm860_vm13, %v1159_v13 }
 0x44a   : > { %3699 = vmatpush.xpose.msk.msrb.mxu2 %vm860_vm13, %v4439_v44 }
 0x44c   : > { %v3925_v39 = vpop.eup %3924 }
 0x44d   : > { %v1155_v26 = vmul.f32 %v3925_v39, %v4475_v28  ;;  %2193 = vrot.lane.b32.xlu1 %v4345_v60, %s4078_s13  ;;  %v1142_v15 = vpop.xlane.xlu0 %1141  ;;  %v3927_v18 = vpop.eup %3926 }
 0x44e   : > { %3928 = vrcp.f32 %v1142_v15  ;;  %v1158_v19 = vmul.f32 %v3927_v18, %v4467_v22 }
 0x44f   : > { %3686 = vmatmul.msk.f32.vlgmr.msra.gmra.mxu1 %vm860_vm13, %v1155_v26 }
 0x450   : > { %1365 = vmatpush.msra.mxu1 %v3824_v16 }
 0x451   : > { %3694 = vmatmul.msk.f32.vlgmr.msra.gmra.mxu2 %vm860_vm13, %v4433_v42 }
 0x452   : > { %3705 = vmatpush.xpose.msk.msra.mxu2 %vm860_vm13, %v4431_v17  ;;  %v1647_v17 = vpop.permute.xlu2 %1646 }
 0x454   : > { %v3929_v44 = vpop.eup %3928 }
 0x455   : > { %v1160_v20 = vmul.f32 %v3929_v44, %v4479_v52  ;;  %2191 = vrot.lane.b32.xlu1 %v4345_v60, %s4077_s12 }
 0x457   : > { %3689 = vmatmul.msk.f32.vlgmr.msrb.gmra.mxu1 %vm860_vm13, %v1158_v19  ;;  %3691 = vmatmul.msk.f32.vlgmr.msra.gmra.mxu3 %vm860_vm13, %v1160_v20 }
 0x458   : > { %3697 = vmatpush.xpose.msk.msrb.mxu1 %vm860_vm13, %v4445_v48  ;;  %3701 = vmatpush.xpose.msk.msra.mxu3 %vm860_vm13, %v1565_v1 }
 0x459   : > { %3700 = vmatmul.msk.f32.vlgmr.msrb.gmra.mxu2 %vm860_vm13, %v4427_v38 }
 0x45a   : > { %v3833_v53 = vpop.permute.xlu2 %3832 }
 0x45b   : > { %v3835_v23 = vunpack.i.h.bf16 %v3833_v53  ;;  %v3834_v38 = vunpack.i.l.bf16 %v3833_v53 }
 0x45f   : > { %3696 = vmatmul.msk.f32.vlgmr.msrb.gmra.mxu3 %vm860_vm13, %v4435_v43 }
 0x460   : > { %v1649_v42 = vpop.permute.xlu0 %1648 }
 0x461   : > { %3706 = vmatmul.msk.f32.vlgmr.msra.gmra.mxu2 %vm860_vm13, %v4457_v62  ;;  %3707 = vmatpush.xpose.msk.msrb.mxu3 %vm860_vm13, %v1649_v42 }
 0x462   : > { %v4600_v13 = vpop.permute.xlu2 %2107 }
 0x467   : > { %3702 = vmatmul.msk.f32.vlgmr.msra.gmra.mxu3 %vm860_vm13, %v1563_v7 }
 0x468   : > { %v3828_v21 = vpop.permute.xlu0 %3827 }
 0x469   : > { %v3830_v48 = vunpack.i.h.bf16 %v3828_v21  ;;  %v3829_v22 = vunpack.i.l.bf16 %v3828_v21 }
 0x46a   : > { %v4603_v39 = vpop.permute.xlu2 %2081 }
 0x46b   : > { %1809 = vmatpush.msrb.mxu2 %v3830_v48  ;;  %1835 = vmatpush.msra.mxu3 %v3829_v22 }
 0x46d   : > { %1913 = vmatpush.msra.mxu2 %v3835_v23 }
 0x46f   : > { %3708 = vmatmul.msk.f32.vlgmr.msrb.gmra.mxu3 %vm860_vm13, %v1647_v17 }
 0x470   : > { %1939 = vmatpush.msrb.mxu3 %v3834_v38  ;;  %v4613_v44 = vpop.permute.xlu0 %2109 }
 0x472   : > { %v4607_v26 = vpop.permute.xlu2 %2079 }
 0x47a   : > { %v4611_v15 = vpop.permute.xlu2 %2219 }
 0x487   : > { %v1145_v43 = vpop.xlane.xlu1 %1144 }
 0x488   : > { %3930 = vrcp.f32 %v1145_v43 }
 0x48e   : > { %v3931_v37 = vpop.eup %3930 }
 0x48f   : > { %v1161_v62 = vmul.f32 %v3931_v37, %v4505_v46 }
 0x491   : > { %3692 = vmatmul.msk.f32.vlgmr.msra.gmra.mxu1 %vm860_vm13, %v1161_v62 }
 0x492   : > { %3703 = vmatpush.xpose.msk.msra.mxu1 %vm860_vm13, %v4503_v36 }
 0x499   : > { %3698 = vmatmul.msk.f32.vlgmr.msrb.gmra.mxu1 %vm860_vm13, %v4449_v54 }
 0x49f   : > { %v1591_v24 = vpop.permute.xlu1 %1590 }
 0x4a1   : > { %3704 = vmatmul.msk.f32.vlgmr.msra.gmra.mxu1 %vm860_vm13, %v1591_v24 }
 0x4a3   : > { %v4575_v35 = vpop.f32.mrf.mxu3 }
 0x4a7   : > { %v3838_v25 = vpop.permute.xlu1 %3837 }
 0x4a8   : > { %v3840_v27 = vunpack.i.h.bf16 %v3838_v25  ;;  %v3839_v28 = vunpack.i.l.bf16 %v3838_v25 }
 0x4aa   : > { %1783 = vmatpush.msrb.mxu1 %v3839_v28  ;;  %1861 = vmatpush.msrb.mxu0 %v3840_v27 }
 0x4af   : > { %v4571_v29 = vpop.permute.xlu1 %2221 }
 0x4b7   : > { %v3843_v52 = vpop.permute.xlu1 %3842 }
 0x4b8   : > { %v3845_v31 = vunpack.i.h.bf16 %v3843_v52  ;;  %v3844_v32 = vunpack.i.l.bf16 %v3843_v52 }
 0x4b9   : > { %v4573_v34 = vpop.f32.mrf.mxu2 }
 0x4ba   : > { %1887 = vmatpush.msra.mxu1 %v3844_v32  ;;  %1965 = vmatpush.msra.mxu0 %v3845_v31 }
 0x4bf   : > { %v4627_v24 = vpop.permute.xlu1 %2193 }
 0x4c4   : > { %v4579_v59 = vpop.f32.mrf.mxu3 }
 0x4c7   : > { %v4631_v27 = vpop.permute.xlu1 %2191 }
 0x4cc   : > { %v4577_v54 = vpop.f32.mrf.mxu2  ;;  %v4588_v1 = vpop.f32.mrf.mxu1 }
 0x4d4   : > { %v1475_v36 = vpop.f32.mrf.mxu2  ;;  %v4592_v2 = vpop.f32.mrf.mxu1 }
 0x4d5   : > { %v1674_v46 = vsel %vm860_vm13, %v1475_v36, -inf }
 0x4d6   : > { %1675 = vmax.xlane.f32.xlu2 %v1674_v46 }
 0x4da   : > { %v4582_v47 = vpop.f32.mrf.mxu3 }
 0x4dc   : > { %v1559_v56 = vpop.f32.mrf.mxu2 }
 0x4dd   : > { %v1683_v45 = vsel %vm860_vm13, %v1559_v56, -inf }
 0x4e2   : > { %v1503_v30 = vpop.f32.mrf.mxu3 }
 0x4e3   : > { %v1677_v49 = vsel %vm860_vm13, %v1503_v30, -inf }
 0x4e4   : > { %1678 = vmax.xlane.f32.xlu0 %v1677_v49  ;;  %v1643_v6 = vpop.f32.mrf.mxu2 }
 0x4e5   : > { %v1692_v7 = vsel %vm860_vm13, %v1643_v6, -inf }
 0x4ea   : > { %v1587_v4 = vpop.f32.mrf.mxu3 }
 0x4eb   : > { %v1686_v41 = vsel %vm860_vm13, %v1587_v4, -inf }
 0x4ec   : > { %1684 = vmax.xlane.f32.xlu0 %v1683_v45 }
 0x4ee   : > { %2137 = vrot.lane.b32.xlu2 %v4337_v57, %s4078_s13 }
 0x4f2   : > { %v1671_v9 = vpop.f32.mrf.mxu3 }
 0x4f3   : > { %v1695_v10 = vsel %vm860_vm13, %v1671_v9, -inf }
 0x500   : > { %2053 = vrot.lane.b32.xlu0 %v4323_v63, %s4078_s13 }
 0x50e   : > { %v4594_v40 = vpop.f32.mrf.mxu1 }
 0x516   : > { %v1531_v50 = vpop.f32.mrf.mxu1 }
 0x517   : > { %1693 = vmax.xlane.f32.xlu2 %v1692_v7  ;;  %v1680_v8 = vsel %vm860_vm13, %v1531_v50, -inf }
 0x518   : > { %1681 = vmax.xlane.f32.xlu1 %v1680_v8 }
 0x51e   : > { %v1615_v11 = vpop.f32.mrf.mxu1 }
 0x51f   : > { %1696 = vmax.xlane.f32.xlu2 %v1695_v10  ;;  %v1689_v14 = vsel %vm860_vm13, %v1615_v11, -inf }
 0x520   : > { %1687 = vmax.xlane.f32.xlu1 %v1686_v41 }
 0x528   : > { %1690 = vmax.xlane.f32.xlu1 %v1689_v14 }
 0x537   : > { %2051 = vrot.lane.b32.xlu2 %v4323_v63, %s4077_s12 }
 0x541   : > { %2135 = vrot.lane.b32.xlu1 %v4337_v57, %s4077_s12 }
 0x549   : > { %v1676_v16 = vpop.xlane.xlu2 %1675 }
 0x54a   : > { %v1698_v18 = vsub.f32 %v1475_v36, %v1676_v16 }
 0x54c   : > { %v1706_v19 = vmul.f32 1.442695, %v1698_v18 }
 0x54e   : > { %3932 = vpow2.f32 %v1706_v19 }
 0x551   : > { %v4629_v25 = vpop.permute.xlu2 %2137 }
 0x554   : > { %v4615_v42 = vpop.eup %3932 }
 0x555   : > { %v1722_v48 = vsel %vm860_vm13, %v4615_v42, 0.0 }
 0x557   : > { %v1679_v20 = vpop.xlane.xlu0 %1678 }
 0x558   : > { %v1699_v17 = vsub.f32 %v1503_v30, %v1679_v20 }
 0x55a   : > { %v1708_v53 = vmul.f32 1.442695, %v1699_v17 }
 0x55c   : > { %3934 = vpow2.f32 %v1708_v53 }
 0x55f   : > { %v1685_v21 = vpop.xlane.xlu0 %1684 }
 0x560   : > { %1723 = vadd.xlane.f32.xlu2 %v1722_v48  ;;  %v1701_v22 = vsub.f32 %v1559_v56, %v1685_v21  ;;  %v3851_v21 = vpack.i.bf16 %v4323_v63, %v4355_v0 }
 0x562   : > { %v1712_v23 = vmul.f32 1.442695, %v1701_v22  ;;  %v4619_v38 = vpop.eup %3934 }
 0x563   : > { %v1725_v43 = vsel %vm860_vm13, %v4619_v38, 0.0 }
 0x564   : > { %3936 = vpow2.f32 %v1712_v23 }
 0x56a   : > { %v4623_v37 = vpop.eup %3936 }
 0x56b   : > { %1726 = vadd.xlane.f32.xlu1 %v1725_v43  ;;  %v1731_v62 = vsel %vm860_vm13, %v4623_v37, 0.0 }
 0x573   : > { %1732 = vadd.xlane.f32.xlu1 %v1731_v62  ;;  %v2054_v62 = vpop.permute.xlu0 %2053 }
 0x58a   : > { %v1694_v28 = vpop.xlane.xlu2 %1693 }
 0x58b   : > { %v1704_v52 = vsub.f32 %v1643_v6, %v1694_v28  ;;  %v1682_v31 = vpop.xlane.xlu1 %1681 }
 0x58c   : > { %v1700_v32 = vsub.f32 %v1531_v50, %v1682_v31 }
 0x58d   : > { %v1718_v36 = vmul.f32 1.442695, %v1704_v52 }
 0x58e   : > { %v1710_v46 = vmul.f32 1.442695, %v1700_v32 }
 0x58f   : > { %3938 = vpow2.f32 %v1718_v36 }
 0x590   : > { %3940 = vpow2.f32 %v1710_v46 }
 0x592   : > { %v1697_v30 = vpop.xlane.xlu2 %1696 }
 0x593   : > { %v1705_v49 = vsub.f32 %v1671_v9, %v1697_v30  ;;  %v1688_v56 = vpop.xlane.xlu1 %1687 }
 0x594   : > { %v1702_v45 = vsub.f32 %v1587_v4, %v1688_v56 }
 0x595   : > { %v4633_v7 = vpop.eup %3938  ;;  %v1720_v8 = vmul.f32 1.442695, %v1705_v49 }
 0x596   : > { %v4635_v10 = vpop.eup %3940  ;;  %v1714_v41 = vmul.f32 1.442695, %v1702_v45  ;;  %v1740_v14 = vsel %vm860_vm13, %v4633_v7, 0.0 }
 0x597   : > { %3942 = vpow2.f32 %v1720_v8  ;;  %1741 = vadd.xlane.f32.xlu2 %v1740_v14  ;;  %v1728_v6 = vsel %vm860_vm13, %v4635_v10, 0.0 }
 0x598   : > { %3944 = vpow2.f32 %v1714_v41  ;;  %1729 = vadd.xlane.f32.xlu0 %v1728_v6 }
 0x59a   : > { %v2052_v48 = vpop.permute.xlu2 %2051 }
 0x59b   : > { %v1691_v50 = vpop.xlane.xlu1 %1690 }
 0x59c   : > { %v1703_v9 = vsub.f32 %v1615_v11, %v1691_v50  ;;  %v3856_v11 = vpack.i.bf16 %v4345_v60, %v4337_v57 }
 0x59d   : > { %v4641_v16 = vpop.eup %3942 }
 0x59e   : > { %v4643_v4 = vpop.eup %3944  ;;  %v1716_v18 = vmul.f32 1.442695, %v1703_v9  ;;  %v1743_v20 = vsel %vm860_vm13, %v4641_v16, 0.0 }
 0x59f   : > { %v1734_v19 = vsel %vm860_vm13, %v4643_v4, 0.0 }
 0x5a0   : > { %3946 = vpow2.f32 %v1716_v18  ;;  %1735 = vadd.xlane.f32.xlu1 %v1734_v19  ;;  %1744 = vadd.xlane.f32.xlu0 %v1743_v20 }
 0x5a6   : > { %v4649_v17 = vpop.eup %3946 }
 0x5a7   : > { %v1737_v53 = vsel %vm860_vm13, %v4649_v17, 0.0 }
 0x5a8   : > { %1738 = vadd.xlane.f32.xlu1 %v1737_v53 }
 0x5af   : > { %2165 = vrot.lane.b32.xlu2 %v4339_v58, %s4078_s13 }
 0x5b3   : > { %v2136_v22 = vpop.permute.xlu1 %2135 }
 0x5b4   : > { %2249 = vrot.lane.b32.xlu0 %v4373_v3, %s4078_s13 }
 0x5b7   : > { %2247 = vrot.lane.b32.xlu2 %v4373_v3, %s4077_s12 }
 0x5bc   : > { %3857 = vrot.lane.b32.xlu0 %v3856_v11, %s4079_s14 }
 0x5bf   : > { %3847 = vrot.lane.b32.xlu2 %v4349_v61, %s4079_s14 }
 0x5c1   : > { %2163 = vrot.lane.b32.xlu1 %v4339_v58, %s4077_s12 }
 0x5c4   : > { %2708 = vrot.lane.b32.xlu0 %v4329_v51, %s4080_s16 }
 0x5c9   : > { %3852 = vrot.lane.b32.xlu1 %v3851_v21, %s4079_s14 }
 0x5cc   : > { %2682 = vrot.lane.b32.xlu0 %v4333_v55, %s4081_s19 }
 0x5d1   : > { %2710 = vrot.lane.b32.xlu1 %v4329_v51, %s4081_s19 }
 0x5d3   : > { %v1724_v61 = vpop.xlane.xlu2 %1723 }
 0x5d4   : > { %3948 = vrcp.f32 %v1724_v61  ;;  %2680 = vrot.lane.b32.xlu0 %v4333_v55, %s4080_s16 }
 0x5d9   : > { %3862 = vrot.lane.b32.xlu1 %v4529_v5, %s4079_s14 }
 0x5da   : > { %v3949_v23 = vpop.eup %3948 }
 0x5db   : > { %v1754_v43 = vmul.f32 %v3949_v23, %v4615_v42 }
 0x5dd   : > { %3709 = vmatmul.msk.f32.vlgmr.msrb.gmra.mxu1 %vm860_vm13, %v1754_v43 }
 0x5de   : > { %3717 = vmatpush.xpose.msk.msrb.mxu1 %vm860_vm13, %v2054_v62  ;;  %v1727_v28 = vpop.xlane.xlu1 %1726 }
 0x5df   : > { %3950 = vrcp.f32 %v1727_v28 }
 0x5e1   : > { %2822 = vrot.lane.b32.xlu1 %v4355_v0, %s4081_s19 }
 0x5e5   : > { %v3951_v52 = vpop.eup %3950 }
 0x5e6   : > { %v1755_v31 = vmul.f32 %v3951_v52, %v4619_v38  ;;  %v1733_v32 = vpop.xlane.xlu1 %1732 }
 0x5e7   : > { %3952 = vrcp.f32 %v1733_v32 }
 0x5e8   : > { %3710 = vmatmul.msk.f32.vlgmr.msrb.gmra.mxu2 %vm860_vm13, %v1755_v31 }
 0x5e9   : > { %3719 = vmatpush.xpose.msk.msrb.mxu2 %vm860_vm13, %v4603_v39  ;;  %2654 = vrot.lane.b32.xlu1 %v4323_v63, %s4081_s19 }
 0x5ed   : > { %v3953_v5 = vpop.eup %3952 }
 0x5ee   : > { %v1757_v42 = vmul.f32 %v3953_v5, %v4623_v37 }
 0x5f0   : > { %3712 = vmatmul.msk.f32.vlgmr.msrb.gmra.mxu0 %vm860_vm13, %v1757_v42 }
 0x5f1   : > { %3723 = vmatpush.xpose.msk.msrb.mxu0 %vm860_vm13, %v4629_v25 }
 0x60a   : > { %v1742_v36 = vpop.xlane.xlu2 %1741 }
 0x60b   : > { %v1730_v38 = vpop.xlane.xlu0 %1729 }
 0x60c   : > { %3954 = vrcp.f32 %v1730_v38 }
 0x60d   : > { %3956 = vrcp.f32 %v1742_v36 }
 0x612   : > { %v3955_v46 = vpop.eup %3954  ;;  %v2166_v30 = vpop.permute.xlu2 %2165 }
 0x613   : > { %v1756_v49 = vmul.f32 %v3955_v46, %v4635_v10  ;;  %v1736_v39 = vpop.xlane.xlu1 %1735  ;;  %v1745_v56 = vpop.xlane.xlu0 %1744 }
 0x614   : > { %3958 = vrcp.f32 %v1736_v39  ;;  %v3957_v37 = vpop.eup %3956 }
 0x615   : > { %3960 = vrcp.f32 %v1745_v56  ;;  %3711 = vmatmul.msk.f32.vlgmr.msra.gmra.mxu3 %vm860_vm13, %v1756_v49  ;;  %v1760_v41 = vmul.f32 %v3957_v37, %v4633_v7 }
 0x616   : > { %3721 = vmatpush.xpose.msk.msra.mxu3 %vm860_vm13, %v4613_v44 }
 0x61a   : > { %v3959_v45 = vpop.eup %3958  ;;  %v2248_v25 = vpop.permute.xlu2 %2247 }
 0x61b   : > { %v3961_v8 = vpop.eup %3960  ;;  %v1758_v14 = vmul.f32 %v3959_v45, %v4643_v4  ;;  %v1739_v6 = vpop.xlane.xlu1 %1738 }
 0x61c   : > { %v1761_v10 = vmul.f32 %v3961_v8, %v4641_v16  ;;  %3962 = vrcp.f32 %v1739_v6 }
 0x61d   : > { %3713 = vmatmul.msk.f32.vlgmr.msra.gmra.mxu1 %vm860_vm13, %v1758_v14  ;;  %3715 = vmatmul.msk.f32.vlgmr.msrb.gmra.mxu3 %vm860_vm13, %v1760_v41 }
 0x61e   : > { %3716 = vmatmul.msk.f32.vlgmr.msra.gmra.mxu0 %vm860_vm13, %v1761_v10  ;;  %3725 = vmatpush.xpose.msk.msra.mxu1 %vm860_vm13, %v2166_v30 }
 0x61f   : > { %3729 = vmatpush.xpose.msk.msrb.mxu3 %vm860_vm13, %v4571_v29 }
 0x622   : > { %v3963_v44 = vpop.eup %3962  ;;  %v3848_v50 = vpop.permute.xlu2 %3847 }
 0x623   : > { %v1759_v7 = vmul.f32 %v3963_v44, %v4649_v17  ;;  %v3849_v9 = vunpack.i.l.bf16 %v3848_v50  ;;  %v3850_v29 = vunpack.i.h.bf16 %v3848_v50 }
 0x625   : > { %3714 = vmatmul.msk.f32.vlgmr.msra.gmra.mxu2 %vm860_vm13, %v1759_v7  ;;  %3718 = vmatmul.msk.f32.vlgmr.msrb.gmra.mxu1 %vm860_vm13, %v2052_v48 }
 0x626   : > { %3722 = vmatmul.msk.f32.vlgmr.msra.gmra.mxu3 %vm860_vm13, %v4600_v13  ;;  %3724 = vmatmul.msk.f32.vlgmr.msrb.gmra.mxu0 %vm860_vm13, %v2136_v22  ;;  %v2250_v16 = vpop.permute.xlu0 %2249 }
 0x627   : > { %3727 = vmatpush.xpose.msk.msra.mxu2 %vm860_vm13, %v4627_v24  ;;  %2436 = vmatpush.msra.mxu3 %v3849_v9 }
 0x628   : > { %3731 = vmatpush.xpose.msk.msra.mxu0 %vm860_vm13, %v2250_v16 }
 0x62d   : > { %3720 = vmatmul.msk.f32.vlgmr.msrb.gmra.mxu2 %vm860_vm13, %v4607_v26 }
 0x62e   : > { %3730 = vmatmul.msk.f32.vlgmr.msrb.gmra.mxu3 %vm860_vm13, %v4611_v15  ;;  %3732 = vmatmul.msk.f32.vlgmr.msra.gmra.mxu0 %vm860_vm13, %v2248_v25  ;;  %v3858_v4 = vpop.permute.xlu0 %3857 }
 0x62f   : > { %2410 = vmatpush.msrb.mxu2 %v3850_v29  ;;  %v3859_v13 = vunpack.i.l.bf16 %v3858_v4  ;;  %v3860_v19 = vunpack.i.h.bf16 %v3858_v4 }
 0x631   : > { %2462 = vmatpush.msrb.mxu0 %v3859_v13 }
 0x633   : > { %v2164_v18 = vpop.permute.xlu1 %2163 }
 0x634   : > { %3726 = vmatmul.msk.f32.vlgmr.msra.gmra.mxu1 %vm860_vm13, %v2164_v18 }
 0x635   : > { %3728 = vmatmul.msk.f32.vlgmr.msra.gmra.mxu2 %vm860_vm13, %v4631_v27 }
 0x636   : > { %2514 = vmatpush.msra.mxu2 %v3860_v19  ;;  %v4758_v8 = vpop.permute.xlu0 %2708 }
 0x63b   : > { %v3853_v24 = vpop.permute.xlu1 %3852 }
 0x63c   : > { %v3855_v20 = vunpack.i.h.bf16 %v3853_v24  ;;  %v3854_v26 = vunpack.i.l.bf16 %v3853_v24 }
 0x63e   : > { %2384 = vmatpush.msrb.mxu1 %v3855_v20  ;;  %2540 = vmatpush.msrb.mxu3 %v3854_v26  ;;  %v4760_v41 = vpop.permute.xlu0 %2682 }
 0x643   : > { %v4720_v15 = vpop.permute.xlu1 %2710 }
 0x646   : > { %v4764_v6 = vpop.permute.xlu0 %2680 }
 0x64b   : > { %v3863_v17 = vpop.permute.xlu1 %3862 }
 0x64c   : > { %v3865_v53 = vunpack.i.h.bf16 %v3863_v17  ;;  %v3864_v11 = vunpack.i.l.bf16 %v3863_v17 }
 0x64e   : > { %2488 = vmatpush.msra.mxu1 %v3864_v11  ;;  %2566 = vmatpush.msra.mxu0 %v3865_v53 }
 0x653   : > { %v4762_v14 = vpop.permute.xlu1 %2822 }
 0x65a   : > { %v4722_v21 = vpop.f32.mrf.mxu1 }
 0x65b   : > { %v4766_v10 = vpop.permute.xlu1 %2654 }
 0x66b   : > { %v4732_v23 = vpop.f32.mrf.mxu2 }
 0x66d   : > { %v4724_v48 = vpop.f32.mrf.mxu0 }
 0x698   : > { %v4726_v61 = vpop.f32.mrf.mxu3 }
 0x69a   : > { %v4728_v27 = vpop.f32.mrf.mxu1 }
 0x69b   : > { %v4730_v22 = vpop.f32.mrf.mxu0 }
 0x6a0   : > { %v4734_v43 = vpop.f32.mrf.mxu3 }
 0x6a2   : > { %v2076_v62 = vpop.f32.mrf.mxu1 }
 0x6a3   : > { %v2160_v28 = vpop.f32.mrf.mxu0  ;;  %v2275_v52 = vsel %vm860_vm13, %v2076_v62, -inf }
 0x6a4   : > { %v2284_v31 = vsel %vm860_vm13, %v2160_v28, -inf  ;;  %2276 = vmax.xlane.f32.xlu0 %v2275_v52 }
 0x6a5   : > { %2285 = vmax.xlane.f32.xlu1 %v2284_v31 }
 0x6a8   : > { %v4738_v32 = vpop.f32.mrf.mxu2 }
 0x6a9   : > { %v2132_v5 = vpop.f32.mrf.mxu3 }
 0x6aa   : > { %v2281_v25 = vsel %vm860_vm13, %v2132_v5, -inf }
 0x6ab   : > { %v2272_v39 = vpop.f32.mrf.mxu0 }
 0x6ac   : > { %v2296_v45 = vsel %vm860_vm13, %v2272_v39, -inf }
 0x6b0   : > { %v2104_v42 = vpop.f32.mrf.mxu2 }
 0x6b1   : > { %v2244_v36 = vpop.f32.mrf.mxu3  ;;  %v2188_v38 = vpop.f32.mrf.mxu1  ;;  %v2278_v46 = vsel %vm860_vm13, %v2104_v42, -inf }
 0x6b2   : > { %2279 = vmax.xlane.f32.xlu1 %v2278_v46  ;;  %v2293_v30 = vsel %vm860_vm13, %v2244_v36, -inf  ;;  %v2287_v49 = vsel %vm860_vm13, %v2188_v38, -inf }
 0x6b3   : > { %2294 = vmax.xlane.f32.xlu2 %v2293_v30  ;;  %2288 = vmax.xlane.f32.xlu0 %v2287_v49 }
 0x6b8   : > { %v2216_v56 = vpop.f32.mrf.mxu2 }
 0x6b9   : > { %v2290_v37 = vsel %vm860_vm13, %v2216_v56, -inf }
 0x6ba   : > { %2297 = vmax.xlane.f32.xlu1 %v2296_v45 }
 0x6bb   : > { %2291 = vmax.xlane.f32.xlu2 %v2290_v37  ;;  %2282 = vmax.xlane.f32.xlu0 %v2281_v25 }
 0x6cf   : > { %2820 = vrot.lane.b32.xlu0 %v4355_v0, %s4080_s16 }
 0x6d3   : > { %2738 = vrot.lane.b32.xlu2 %v4337_v57, %s4081_s19  ;;  %2652 = vrot.lane.b32.xlu1 %v4323_v63, %s4080_s16 }
 0x6d7   : > { %2736 = vrot.lane.b32.xlu0 %v4337_v57, %s4080_s16 }
 0x6db   : > { %2794 = vrot.lane.b32.xlu1 %v4345_v60, %s4081_s19 }
 0x6df   : > { %2792 = vrot.lane.b32.xlu0 %v4345_v60, %s4080_s16 }
 0x717   : > { %v2277_v44 = vpop.xlane.xlu0 %2276 }
 0x718   : > { %v2286_v50 = vpop.xlane.xlu1 %2285  ;;  %v2299_v7 = vsub.f32 %v2076_v62, %v2277_v44 }
 0x719   : > { %v2302_v9 = vsub.f32 %v2160_v28, %v2286_v50 }
 0x71a   : > { %v2307_v16 = vmul.f32 1.442695, %v2299_v7 }
 0x71b   : > { %v2313_v29 = vmul.f32 1.442695, %v2302_v9 }
 0x71c   : > { %3964 = vpow2.f32 %v2307_v16 }
 0x71d   : > { %3966 = vpow2.f32 %v2313_v29 }
 0x722   : > { %v4768_v4 = vpop.eup %3964 }
 0x723   : > { %v4770_v13 = vpop.eup %3966  ;;  %v2323_v18 = vsel %vm860_vm13, %v4768_v4, 0.0 }
 0x724   : > { %2324 = vadd.xlane.f32.xlu0 %v2323_v18  ;;  %v2332_v19 = vsel %vm860_vm13, %v4770_v13, 0.0 }
 0x725   : > { %2333 = vadd.xlane.f32.xlu1 %v2332_v19  ;;  %v2280_v24 = vpop.xlane.xlu1 %2279 }
 0x726   : > { %v2295_v20 = vpop.xlane.xlu2 %2294  ;;  %v2289_v26 = vpop.xlane.xlu0 %2288  ;;  %v2300_v28 = vsub.f32 %v2104_v42, %v2280_v24 }
 0x727   : > { %v2305_v17 = vsub.f32 %v2244_v36, %v2295_v20  ;;  %v2303_v53 = vsub.f32 %v2188_v38, %v2289_v26 }
 0x728   : > { %v2309_v52 = vmul.f32 1.442695, %v2300_v28 }
 0x729   : > { %v2319_v11 = vmul.f32 1.442695, %v2305_v17  ;;  %v2315_v62 = vmul.f32 1.442695, %v2303_v53 }
 0x72b   : > { %3968 = vpow2.f32 %v2319_v11 }
 0x72c   : > { %3970 = vpow2.f32 %v2315_v62 }
 0x72d   : > { %v2298_v31 = vpop.xlane.xlu1 %2297  ;;  %3972 = vpow2.f32 %v2309_v52 }
 0x72e   : > { %v2283_v46 = vpop.xlane.xlu0 %2282  ;;  %v2292_v30 = vpop.xlane.xlu2 %2291  ;;  %v2306_v45 = vsub.f32 %v2272_v39, %v2298_v31 }
 0x72f   : > { %v2301_v49 = vsub.f32 %v2132_v5, %v2283_v46  ;;  %v2304_v50 = vsub.f32 %v2216_v56, %v2292_v30 }
 0x730   : > { %v2321_v38 = vmul.f32 1.442695, %v2306_v45 }
 0x731   : > { %v4776_v37 = vpop.eup %3968  ;;  %v2311_v25 = vmul.f32 1.442695, %v2301_v49  ;;  %v2317_v7 = vmul.f32 1.442695, %v2304_v50 }
 0x732   : > { %v3971_v44 = vpop.eup %3970  ;;  %v2341_v36 = vsel %vm860_vm13, %v4776_v37, 0.0 }
 0x733   : > { %2342 = vadd.xlane.f32.xlu1 %v2341_v36  ;;  %v2335_v42 = vsel %vm860_vm13, %v3971_v44, 0.0  ;;  %3974 = vpow2.f32 %v2311_v25  ;;  %v3973_v9 = vpop.eup %3972 }
 0x734   : > { %2336 = vadd.xlane.f32.xlu0 %v2335_v42  ;;  %3976 = vpow2.f32 %v2321_v38  ;;  %v2326_v39 = vsel %vm860_vm13, %v3973_v9, 0.0 }
 0x735   : > { %3978 = vpow2.f32 %v2317_v7 }
 0x736   : > { %v2739_v30 = vpop.permute.xlu2 %2738 }
 0x739   : > { %v3975_v5 = vpop.eup %3974 }
 0x73a   : > { %v2329_v16 = vsel %vm860_vm13, %v3975_v5, 0.0  ;;  %v3977_v56 = vpop.eup %3976 }
 0x73b   : > { %2330 = vadd.xlane.f32.xlu2 %v2329_v16  ;;  %v3979_v29 = vpop.eup %3978  ;;  %v2344_v18 = vsel %vm860_vm13, %v3977_v56, 0.0 }
 0x73c   : > { %2327 = vadd.xlane.f32.xlu0 %v2326_v39  ;;  %v2338_v19 = vsel %vm860_vm13, %v3979_v29, 0.0 }
 0x741   : > { %v4793_v24 = vpop.permute.xlu0 %2820 }
 0x743   : > { %2345 = vadd.xlane.f32.xlu2 %v2344_v18 }
 0x744   : > { %2339 = vadd.xlane.f32.xlu0 %v2338_v19 }
 0x745   : > { %v2653_v26 = vpop.permute.xlu1 %2652 }
 0x749   : > { %v2737_v20 = vpop.permute.xlu0 %2736 }
 0x74c   : > { %2766 = vrot.lane.b32.xlu1 %v4339_v58, %s4081_s19 }
 0x74d   : > { %v2795_v53 = vpop.permute.xlu1 %2794 }
 0x751   : > { %v2793_v17 = vpop.permute.xlu0 %2792 }
 0x754   : > { %2848 = vrot.lane.b32.xlu1 %v4373_v3, %s4080_s16 }
 0x758   : > { %2850 = vrot.lane.b32.xlu0 %v4373_v3, %s4081_s19 }
 0x75b   : > { %2764 = vrot.lane.b32.xlu2 %v4339_v58, %s4080_s16 }
 0x797   : > { %v2325_v11 = vpop.xlane.xlu0 %2324 }
 0x798   : > { %3980 = vrcp.f32 %v2325_v11  ;;  %v2334_v62 = vpop.xlane.xlu1 %2333 }
 0x799   : > { %3982 = vrcp.f32 %v2334_v62 }
 0x79e   : > { %v3981_v28 = vpop.eup %3980 }
 0x79f   : > { %v3983_v52 = vpop.eup %3982  ;;  %v2355_v31 = vmul.f32 %v3981_v28, %v4768_v4 }
 0x7a0   : > { %v2358_v46 = vmul.f32 %v3983_v52, %v4770_v13 }
 0x7a1   : > { %3733 = vmatmul.msk.f32.vlgmr.msrb.gmra.mxu1 %vm860_vm13, %v2355_v31 }
 0x7a2   : > { %3736 = vmatmul.msk.f32.vlgmr.msrb.gmra.mxu0 %vm860_vm13, %v2358_v46  ;;  %3741 = vmatpush.xpose.msk.msrb.mxu1 %vm860_vm13, %v4766_v10 }
 0x7a3   : > { %3747 = vmatpush.xpose.msk.msrb.mxu0 %vm860_vm13, %v2739_v30 }
 0x7a6   : > { %v2343_v4 = vpop.xlane.xlu1 %2342 }
 0x7a7   : > { %v2337_v49 = vpop.xlane.xlu0 %2336 }
 0x7a8   : > { %3984 = vrcp.f32 %v2337_v49 }
 0x7ae   : > { %v3985_v45 = vpop.eup %3984  ;;  %v2331_v36 = vpop.xlane.xlu2 %2330 }
 0x7af   : > { %v2359_v25 = vmul.f32 %v3985_v45, %v3971_v44  ;;  %v2328_v50 = vpop.xlane.xlu0 %2327 }
 0x7b0   : > { %3986 = vrcp.f32 %v2328_v50 }
 0x7b1   : > { %3988 = vrcp.f32 %v2331_v36  ;;  %3737 = vmatmul.msk.f32.vlgmr.msra.gmra.mxu1 %vm860_vm13, %v2359_v25 }
 0x7b2   : > { %3990 = vrcp.f32 %v2343_v4 }
 0x7b6   : > { %v3987_v13 = vpop.eup %3986  ;;  %v2346_v39 = vpop.xlane.xlu2 %2345 }
 0x7b7   : > { %v3989_v42 = vpop.eup %3988  ;;  %v2356_v38 = vmul.f32 %v3987_v13, %v3973_v9  ;;  %v2340_v7 = vpop.xlane.xlu0 %2339 }
 0x7b8   : > { %v2357_v10 = vmul.f32 %v3989_v42, %v3975_v5  ;;  %3992 = vrcp.f32 %v2340_v7  ;;  %v3991_v44 = vpop.eup %3990 }
 0x7b9   : > { %3994 = vrcp.f32 %v2346_v39  ;;  %3734 = vmatmul.msk.f32.vlgmr.msrb.gmra.mxu2 %vm860_vm13, %v2356_v38  ;;  %3742 = vmatmul.msk.f32.vlgmr.msrb.gmra.mxu1 %vm860_vm13, %v2653_v26  ;;  %v2361_v5 = vmul.f32 %v3991_v44, %v4776_v37 }
 0x7ba   : > { %3735 = vmatmul.msk.f32.vlgmr.msra.gmra.mxu3 %vm860_vm13, %v2357_v10  ;;  %3743 = vmatpush.xpose.msk.msrb.mxu2 %vm860_vm13, %v4760_v41 }
 0x7bb   : > { %3745 = vmatpush.xpose.msk.msra.mxu3 %vm860_vm13, %v4720_v15 }
 0x7be   : > { %v3993_v16 = vpop.eup %3992  ;;  %v2767_v9 = vpop.permute.xlu1 %2766 }
 0x7bf   : > { %v3995_v18 = vpop.eup %3994  ;;  %v2360_v19 = vmul.f32 %v3993_v16, %v3979_v29  ;;  %3749 = vmatpush.xpose.msk.msra.mxu1 %vm860_vm13, %v2767_v9  ;;  %v2765_v41 = vpop.permute.xlu2 %2764 }
 0x7c0   : > { %v2362_v11 = vmul.f32 %v3995_v18, %v3977_v56 }
 0x7c1   : > { %3738 = vmatmul.msk.f32.vlgmr.msra.gmra.mxu2 %vm860_vm13, %v2360_v19 }
 0x7c2   : > { %3739 = vmatmul.msk.f32.vlgmr.msrb.gmra.mxu3 %vm860_vm13, %v2361_v5  ;;  %3740 = vmatmul.msk.f32.vlgmr.msra.gmra.mxu0 %vm860_vm13, %v2362_v11 }
 0x7c3   : > { %3751 = vmatpush.xpose.msk.msra.mxu2 %vm860_vm13, %v2795_v53  ;;  %3753 = vmatpush.xpose.msk.msrb.mxu3 %vm860_vm13, %v4762_v14 }
 0x7c4   : > { %3750 = vmatmul.msk.f32.vlgmr.msra.gmra.mxu1 %vm860_vm13, %v2765_v41 }
 0x7c6   : > { %v2849_v37 = vpop.permute.xlu1 %2848 }
 0x7c9   : > { %3744 = vmatmul.msk.f32.vlgmr.msrb.gmra.mxu2 %vm860_vm13, %v4764_v6 }
 0x7ca   : > { %3746 = vmatmul.msk.f32.vlgmr.msra.gmra.mxu3 %vm860_vm13, %v4758_v8  ;;  %3748 = vmatmul.msk.f32.vlgmr.msrb.gmra.mxu0 %vm860_vm13, %v2737_v20  ;;  %v2851_v15 = vpop.permute.xlu0 %2850 }
 0x7cb   : > { %3755 = vmatpush.xpose.msk.msra.mxu0 %vm860_vm13, %v2851_v15 }
 0x7d1   : > { %3752 = vmatmul.msk.f32.vlgmr.msra.gmra.mxu2 %vm860_vm13, %v2793_v17 }
 0x7d2   : > { %3754 = vmatmul.msk.f32.vlgmr.msrb.gmra.mxu3 %vm860_vm13, %v4793_v24  ;;  %3756 = vmatmul.msk.f32.vlgmr.msra.gmra.mxu0 %vm860_vm13, %v2849_v37 }
 0x81e   : > { %v4829_v14 = vpop.f32.mrf.mxu1 }
 0x81f   : > { %v4833_v29 = vpop.f32.mrf.mxu0 }
 0x82e   : > { %v4831_v56 = vpop.f32.mrf.mxu1 }
 0x836   : > { %v2677_v6 = vpop.f32.mrf.mxu1 }
 0x837   : > { %v2876_v8 = vsel %vm860_vm13, %v2677_v6, -inf }
 0x838   : > { %2877 = vmax.xlane.f32.xlu0 %v2876_v8 }
 0x83c   : > { %v4836_v20 = vpop.f32.mrf.mxu2 }
 0x83d   : > { %v4838_v26 = vpop.f32.mrf.mxu3 }
 0x83f   : > { %v4840_v17 = vpop.f32.mrf.mxu0 }
 0x841   : > { %v2789_v52 = vpop.f32.mrf.mxu1 }
 0x842   : > { %v2888_v45 = vsel %vm860_vm13, %v2789_v52, -inf }
 0x844   : > { %v4844_v24 = vpop.f32.mrf.mxu2 }
 0x845   : > { %v4842_v53 = vpop.f32.mrf.mxu3 }
 0x847   : > { %v2761_v62 = vpop.f32.mrf.mxu0 }
 0x848   : > { %v2885_v28 = vsel %vm860_vm13, %v2761_v62, -inf }
 0x849   : > { %2886 = vmax.xlane.f32.xlu1 %v2885_v28 }
 0x84c   : > { %v2705_v25 = vpop.f32.mrf.mxu2 }
 0x84d   : > { %v2733_v31 = vpop.f32.mrf.mxu3  ;;  %v2879_v36 = vsel %vm860_vm13, %v2705_v25, -inf }
 0x84e   : > { %v2882_v46 = vsel %vm860_vm13, %v2733_v31, -inf }
 0x84f   : > { %v4848_v30 = vpop.f32.mrf.mxu0  ;;  %2883 = vmax.xlane.f32.xlu2 %v2882_v46  ;;  %v3871_v46 = vpack.i.bf16 %v4333_v55, %v4337_v57 }
 0x850   : > { %v2897_v49 = vsel %vm860_vm13, %v4848_v30, -inf }
 0x851   : > { %2898 = vmax.xlane.f32.xlu0 %v2897_v49  ;;  %2889 = vmax.xlane.f32.xlu1 %v2888_v45 }
 0x854   : > { %v2817_v13 = vpop.f32.mrf.mxu2 }
 0x855   : > { %v2845_v50 = vpop.f32.mrf.mxu3  ;;  %v2891_v42 = vsel %vm860_vm13, %v2817_v13, -inf }
 0x856   : > { %v2894_v4 = vsel %vm860_vm13, %v2845_v50, -inf }
 0x857   : > { %2880 = vmax.xlane.f32.xlu2 %v2879_v36 }
 0x859   : > { %2895 = vmax.xlane.f32.xlu0 %v2894_v4 }
 0x85f   : > { %2892 = vmax.xlane.f32.xlu2 %v2891_v42 }
 0x8ab   : > { %v2878_v38 = vpop.xlane.xlu0 %2877 }
 0x8ac   : > { %v2900_v7 = vsub.f32 %v2677_v6, %v2878_v38 }
 0x8ae   : > { %v2908_v39 = vmul.f32 1.442695, %v2900_v7 }
 0x8b0   : > { %3996 = vpow2.f32 %v2908_v39 }
 0x8b6   : > { %v4856_v10 = vpop.eup %3996 }
 0x8b7   : > { %v2924_v44 = vsel %vm860_vm13, %v4856_v10, 0.0 }
 0x8b8   : > { %2925 = vadd.xlane.f32.xlu2 %v2924_v44 }
 0x8bc   : > { %v2887_v16 = vpop.xlane.xlu1 %2886 }
 0x8bd   : > { %v2903_v9 = vsub.f32 %v2761_v62, %v2887_v16 }
 0x8bf   : > { %v2914_v18 = vmul.f32 1.442695, %v2903_v9 }
 0x8c1   : > { %3998 = vpow2.f32 %v2914_v18 }
 0x8c2   : > { %v2884_v19 = vpop.xlane.xlu2 %2883 }
 0x8c3   : > { %v2902_v37 = vsub.f32 %v2733_v31, %v2884_v19 }
 0x8c4   : > { %v2890_v5 = vpop.xlane.xlu1 %2889  ;;  %v2899_v38 = vpop.xlane.xlu0 %2898 }
 0x8c5   : > { %v2904_v11 = vsub.f32 %v2789_v52, %v2890_v5  ;;  %v2912_v28 = vmul.f32 1.442695, %v2902_v37 }
 0x8c7   : > { %v4860_v41 = vpop.eup %3998  ;;  %v2916_v15 = vmul.f32 1.442695, %v2904_v11  ;;  %v2907_v11 = vsub.f32 %v4848_v30, %v2899_v38  ;;  %v3661_v30 = vmul.f32 -1.442695, %v4323_v63 }
 0x8c8   : > { %v2933_v6 = vsel %vm860_vm13, %v4860_v41, 0.0 }
 0x8c9   : > { %2934 = vadd.xlane.f32.xlu0 %v2933_v6  ;;  %4000 = vpow2.f32 %v2916_v15  ;;  %v2922_v37 = vmul.f32 1.442695, %v2907_v11  ;;  %v3876_v6 = vpack.i.bf16 %v4339_v58, %v4355_v0 }
 0x8ca   : > { %v2881_v8 = vpop.xlane.xlu2 %2880  ;;  %4002 = vpow2.f32 %v2912_v28 }
 0x8cb   : > { %v2901_v49 = vsub.f32 %v2705_v25, %v2881_v8  ;;  %v3866_v25 = vpack.i.bf16 %v4323_v63, %v4329_v51  ;;  %v3667_v63 = vmul.f32 -1.442695, %v4355_v0 }
 0x8cc   : > { %v2896_v16 = vpop.xlane.xlu0 %2895 }
 0x8cd   : > { %v2910_v31 = vmul.f32 1.442695, %v2901_v49  ;;  %v2906_v9 = vsub.f32 %v2845_v50, %v2896_v16 }
 0x8cf   : > { %v4866_v62 = vpop.eup %4000  ;;  %4004 = vpow2.f32 %v2910_v31  ;;  %v2920_v19 = vmul.f32 1.442695, %v2906_v9 }
 0x8d0   : > { %3872 = vrot.lane.b32.xlu2 %v3871_v46, %s4082_s20  ;;  %v2936_v52 = vsel %vm860_vm13, %v4866_v62, 0.0  ;;  %v4871_v36 = vpop.eup %4002 }
 0x8d1   : > { %2937 = vadd.xlane.f32.xlu1 %v2936_v52  ;;  %v2930_v42 = vsel %vm860_vm13, %v4871_v36, 0.0  ;;  %v3665_v52 = vmul.f32 -1.442695, %v4339_v58 }
 0x8d2   : > { %v2893_v45 = vpop.xlane.xlu2 %2892 }
 0x8d3   : > { %v2905_v4 = vsub.f32 %v2817_v13, %v2893_v45 }
 0x8d5   : > { %v2918_v7 = vmul.f32 1.442695, %v2905_v4  ;;  %v4878_v39 = vpop.eup %4004 }
 0x8d6   : > { %v2927_v44 = vsel %vm860_vm13, %v4878_v39, 0.0 }
 0x8d7   : > { %4006 = vpow2.f32 %v2918_v7 }
 0x8d8   : > { %4008 = vpow2.f32 %v2920_v19 }
 0x8d9   : > { %2931 = vadd.xlane.f32.xlu1 %v2930_v42  ;;  %4010 = vpow2.f32 %v2922_v37 }
 0x8dd   : > { %3867 = vrot.lane.b32.xlu0 %v3866_v25, %s4082_s20  ;;  %v4882_v13 = vpop.eup %4006 }
 0x8de   : > { %v2939_v18 = vsel %vm860_vm13, %v4882_v13, 0.0  ;;  %v4886_v5 = vpop.eup %4008 }
 0x8df   : > { %v2942_v15 = vsel %vm860_vm13, %v4886_v5, 0.0  ;;  %v4893_v50 = vpop.eup %4010 }
 0x8e0   : > { %v2945_v8 = vsel %vm860_vm13, %v4893_v50, 0.0 }
 0x8e1   : > { %2928 = vadd.xlane.f32.xlu1 %v2927_v44 }
 0x8e9   : > { %2940 = vadd.xlane.f32.xlu1 %v2939_v18 }
 0x8f9   : > { %2943 = vadd.xlane.f32.xlu2 %v2942_v15 }
 0x902   : > { %3877 = vrot.lane.b32.xlu1 %v3876_v6, %s4082_s20 }
 0x907   : > { %2946 = vadd.xlane.f32.xlu0 %v2945_v8 }
 0x90a   : > { %1984 = vrot.lane.b32.xlu1 %v4724_v48, %s4080_s16 }
 0x911   : > { %3094 = vrot.lane.b32.xlu2 %v4345_v60, %s4082_s20 }
 0x912   : > { %1978 = vrot.lane.b32.xlu1 %v4722_v21, %s4080_s16 }
 0x919   : > { %3146 = vrot.lane.b32.xlu2 %v4373_v3, %s4082_s20 }
 0x91a   : > { %1386 = vrot.lane.b32.xlu1 %v4592_v2, %s4069_s23 }
 0x91b   : > { %2579 = vrot.lane.b32.xlu0 %v4829_v14, %s4077_s12 }
 0x921   : > { %1384 = vrot.lane.b32.xlu2 %v4579_v59, %s4069_s23 }
 0x922   : > { %1986 = vrot.lane.b32.xlu1 %v4728_v27, %s4080_s16 }
 0x923   : > { %2591 = vrot.lane.b32.xlu0 %v4842_v53, %s4077_s12 }
 0x929   : > { %2585 = vrot.lane.b32.xlu2 %v4833_v29, %s4077_s12 }
 0x92a   : > { %2587 = vrot.lane.b32.xlu1 %v4831_v56, %s4077_s12 }
 0x92b   : > { %1988 = vrot.lane.b32.xlu0 %v4738_v32, %s4080_s16  ;;  %v2926_v2 = vpop.xlane.xlu2 %2925 }
 0x931   : > { %1378 = vrot.lane.b32.xlu2 %v4575_v35, %s4069_s23 }
 0x932   : > { %1380 = vrot.lane.b32.xlu1 %v4588_v1, %s4069_s23 }
 0x933   : > { %2593 = vrot.lane.b32.xlu0 %v4840_v17, %s4077_s12  ;;  %v3873_v59 = vpop.permute.xlu2 %3872 }
 0x934   : > { %v3875_v21 = vunpack.i.h.bf16 %v3873_v59  ;;  %v3874_v48 = vunpack.i.l.bf16 %v3873_v59 }
 0x936   : > { %3011 = vmatpush.msrb.mxu2 %v3875_v21  ;;  %3063 = vmatpush.msrb.mxu0 %v3874_v48 }
 0x939   : > { %1390 = vrot.lane.b32.xlu2 %v4582_v47, %s4069_s23 }
 0x93a   : > { %2581 = vrot.lane.b32.xlu1 %v4836_v20, %s4077_s12 }
 0x93c   : > { %v2935_v27 = vpop.xlane.xlu0 %2934 }
 0x93d   : > { %4012 = vrcp.f32 %v2935_v27 }
 0x93e   : > { %4014 = vrcp.f32 %v2926_v2 }
 0x941   : > { %1990 = vrot.lane.b32.xlu2 %v4734_v43, %s4080_s16 }
 0x942   : > { %1392 = vrot.lane.b32.xlu1 %v4594_v40, %s4069_s23  ;;  %v3664_v40 = vmul.f32 -1.442695, %v4337_v57 }
 0x943   : > { %v4013_v35 = vpop.eup %4012 }
 0x944   : > { %v2959_v1 = vmul.f32 %v4013_v35, %v4860_v41  ;;  %v2938_v32 = vpop.xlane.xlu1 %2937  ;;  %v4015_v14 = vpop.eup %4014 }
 0x945   : > { %v2956_v20 = vmul.f32 %v4015_v14, %v4856_v10 }
 0x946   : > { %3760 = vmatmul.msk.f32.vlgmr.msrb.gmra.mxu0 %vm860_vm13, %v2959_v1 }
 0x949   : > { %1980 = vrot.lane.b32.xlu2 %v4732_v23, %s4080_s16 }
 0x94a   : > { %2589 = vrot.lane.b32.xlu1 %v4844_v24, %s4077_s12 }
 0x94c   : > { %v2932_v47 = vpop.xlane.xlu1 %2931 }
 0x94d   : > { %4016 = vrcp.f32 %v2932_v47 }
 0x94e   : > { %4018 = vpow2.f32 %v3664_v40 }
 0x94f   : > { %v3868_v43 = vpop.permute.xlu0 %3867 }
 0x950   : > { %v3870_v56 = vunpack.i.h.bf16 %v3868_v43  ;;  %v3869_v29 = vunpack.i.l.bf16 %v3868_v43 }
 0x951   : > { %1388 = vrot.lane.b32.xlu2 %v4577_v54, %s4069_s23 }
 0x952   : > { %2985 = vmatpush.msrb.mxu1 %v3870_v56  ;;  %3037 = vmatpush.msra.mxu3 %v3869_v29 }
 0x953   : > { %1382 = vrot.lane.b32.xlu1 %v4573_v34, %s4069_s23  ;;  %3757 = vmatmul.msk.f32.vlgmr.msrb.gmra.mxu1 %vm860_vm13, %v2956_v20  ;;  %v4017_v23 = vpop.eup %4016 }
 0x954   : > { %v2958_v17 = vmul.f32 %v4017_v23, %v4871_v36  ;;  %v2929_v53 = vpop.xlane.xlu1 %2928  ;;  %v4019_v57 = vpop.eup %4018 }
 0x955   : > { %4020 = vrcp.f32 %v2929_v53  ;;  %v732_v24 = vadd.f32 1.0, %v4019_v57 }
 0x956   : > { %3759 = vmatmul.msk.f32.vlgmr.msra.gmra.mxu3 %vm860_vm13, %v2958_v17 }
 0x957   : > { %4022 = vrcp.f32 %v732_v24  ;;  %v793_v16 = vand.u32 2147483648, %v732_v24  ;;  %vm787_vm15 = vweird.f32 %v732_v24 }
 0x958   : > { %4024 = vpow2.f32 %v3661_v30 }
 0x959   : > { %1992 = vrot.lane.b32.xlu2 %v4730_v22, %s4080_s16  ;;  %v794_v15 = vor.u32 1.1754944e-38, %v793_v16 }
 0x95b   : > { %2583 = vrot.lane.b32.xlu1 %v4838_v26, %s4077_s12  ;;  %v4021_v54 = vpop.eup %4020 }
 0x95c   : > { %v2957_v34 = vmul.f32 %v4021_v54, %v4878_v39  ;;  %v2941_v41 = vpop.xlane.xlu1 %2940 }
 0x95d   : > { %v4023_v10 = vpop.eup %4022  ;;  %4026 = vrcp.f32 %v2941_v41 }
 0x95e   : > { %3758 = vmatmul.msk.f32.vlgmr.msrb.gmra.mxu2 %vm860_vm13, %v2957_v34  ;;  %v4025_v22 = vpop.eup %4024  ;;  %v783_v28 = vmul.f32 %v4023_v10, %v732_v24  ;;  %vm788_vm14 = vweird.f32 %v4023_v10 }
 0x95f   : > { %v4960_v26 = vadd.f32 1.0, %v4025_v22  ;;  %vm789_vm2 = vmor %vm787_vm15, %vm788_vm14 }
 0x960   : > { %v784_v49 = vsub.f32 1.0, %v783_v28 }
 0x961   : > { %1982 = vrot.lane.b32.xlu2 %v4726_v61, %s4080_s16  ;;  %v748_v29 = vand.u32 2147483648, %v4960_v26  ;;  %vm742_vm5 = vweird.f32 %v4960_v26  ;;  %v746_v40 = vand.u32 2147483647, %v4960_v26 }
 0x962   : > { %v785_v61 = vmul.f32 %v4023_v10, %v784_v49 }
 0x963   : > { %v4027_v31 = vpop.eup %4026  ;;  %v749_v17 = vor.u32 1.1754944e-38, %v748_v29  ;;  %vm747_vm7 = vcmp.eq.f32.partialorder %v746_v40, 8.507059e+37 }
 0x964   : > { %v2961_v4 = vmul.f32 %v4027_v31, %v4882_v13  ;;  %v786_v58 = vadd.f32 %v4023_v10, %v785_v61  ;;  %v791_v13 = vand.u32 2147483647, %v732_v24 }
 0x966   : > { %vm792_vm3 = vcmp.eq.f32.partialorder %v791_v13, 8.507059e+37  ;;  %v3666_v13 = vmul.f32 -1.442695, %v4345_v60 }
 0x96c   : > { %v2944_v46 = vpop.xlane.xlu2 %2943 }
 0x96d   : > { %4028 = vrcp.f32 %v2944_v46 }
 0x96e   : > { %4030 = vrcp.f32 %v2938_v32 }
 0x96f   : > { %4032 = vrcp.f32 %v4960_v26 }
 0x970   : > { %4034 = vpow2.f32 %v3665_v52 }
 0x971   : > { %4036 = vpow2.f32 %v3667_v63 }
 0x973   : > { %v4029_v45 = vpop.eup %4028 }
 0x974   : > { %v4031_v36 = vpop.eup %4030  ;;  %v3095_v42 = vpop.permute.xlu2 %3094  ;;  %v2962_v38 = vmul.f32 %v4029_v45, %v4886_v5  ;;  %v790_v5 = vsel %vm789_vm2, %v4023_v10, %v786_v58 }
 0x975   : > { %v3878_v25 = vpop.permute.xlu1 %3877  ;;  %3115 = vmatpush.msra.mxu2 %v3095_v42  ;;  %v4033_v0 = vpop.eup %4032  ;;  %v2960_v44 = vmul.f32 %v4031_v36, %v4866_v62  ;;  %v4976_v8 = vsel %vm792_vm3, %v794_v15, %v790_v5 }
 0x976   : > { %v3880_v7 = vunpack.i.h.bf16 %v3878_v25  ;;  %v3879_v39 = vunpack.i.l.bf16 %v3878_v25  ;;  %3762 = vmatmul.msk.f32.vlgmr.msra.gmra.mxu2 %vm860_vm13, %v2961_v4  ;;  %v4035_v9 = vpop.eup %4034  ;;  %v738_v11 = vmul.f32 %v4033_v0, %v4960_v26  ;;  %vm743_vm4 = vweird.f32 %v4033_v0 }
 0x977   : > { %v4037_v18 = vpop.eup %4036  ;;  %v4972_v37 = vadd.f32 1.0, %v4035_v9  ;;  %vm744_vm6 = vmor %vm742_vm5, %vm743_vm4 }
 0x978   : > { %3089 = vmatpush.msra.mxu1 %v3880_v7  ;;  %3141 = vmatpush.msrb.mxu3 %v3879_v39  ;;  %v4974_v6 = vadd.f32 1.0, %v4037_v18  ;;  %v739_v21 = vsub.f32 1.0, %v738_v11 }
 0x979   : > { %3761 = vmatmul.msk.f32.vlgmr.msra.gmra.mxu1 %vm860_vm13, %v2960_v44  ;;  %3763 = vmatmul.msk.f32.vlgmr.msrb.gmra.mxu3 %vm860_vm13, %v2962_v38  ;;  %vm802_vm10 = vweird.f32 %v4972_v37  ;;  %v808_v31 = vand.u32 2147483648, %v4972_v37  ;;  %v806_v45 = vand.u32 2147483647, %v4972_v37 }
 0x97a   : > { %v2947_v19 = vpop.xlane.xlu0 %2946  ;;  %v740_v35 = vmul.f32 %v4033_v0, %v739_v21  ;;  %v838_v61 = vand.u32 2147483648, %v4974_v6  ;;  %vm832_vm12 = vweird.f32 %v4974_v6  ;;  %v836_v36 = vand.u32 2147483647, %v4974_v6 }
 0x97b   : > { %4038 = vrcp.f32 %v2947_v19  ;;  %v809_v38 = vor.u32 1.1754944e-38, %v808_v31  ;;  %vm807_vm15 = vcmp.eq.f32.partialorder %v806_v45, 8.507059e+37 }
 0x97c   : > { %v3147_v62 = vpop.permute.xlu2 %3146  ;;  %4040 = vrcp.f32 %v4972_v37  ;;  %v741_v43 = vadd.f32 %v4033_v0, %v740_v35  ;;  %v839_v7 = vor.u32 1.1754944e-38, %v838_v61  ;;  %vm837_vm2 = vcmp.eq.f32.partialorder %v836_v36, 8.507059e+37 }
 0x97d   : > { %v1985_v2 = vpop.permute.xlu1 %1984  ;;  %3167 = vmatpush.msra.mxu0 %v3147_v62  ;;  %4042 = vrcp.f32 %v4974_v6 }
 0x97e   : > { %v2005_v59 = vmul.f32 %v1985_v2, %v4976_v8  ;;  %v745_v23 = vsel %vm744_vm6, %v4033_v0, %v741_v43  ;;  %4044 = vpow2.f32 %v3666_v13 }
 0x97f   : > { %v4991_v54 = vsel %vm747_vm7, %v749_v17, %v745_v23  ;;  %vm2042_vm7 = vcmask 130112  }
 0x980   : > { %2024 = vrot.lane.b32.xlu1 %v2005_v59, %s4068_s22 }
 0x981   : > { %v4039_v48 = vpop.eup %4038 }
 0x982   : > { %v2963_v27 = vmul.f32 %v4039_v48, %v4893_v50  ;;  %v4041_v32 = vpop.eup %4040 }
 0x983   : > { %v4043_v14 = vpop.eup %4042  ;;  %v798_v50 = vmul.f32 %v4041_v32, %v4972_v37  ;;  %vm803_vm8 = vweird.f32 %v4041_v32 }
 0x984   : > { %3764 = vmatmul.msk.f32.vlgmr.msra.gmra.mxu0 %vm860_vm13, %v2963_v27  ;;  %v1385_v1 = vpop.permute.xlu2 %1384  ;;  %v828_v20 = vmul.f32 %v4043_v14, %v4974_v6  ;;  %vm833_vm9 = vweird.f32 %v4043_v14  ;;  %vm804_vm11 = vmor %vm802_vm10, %vm803_vm8  ;;  %v4045_v18 = vpop.eup %4044  ;;  %vm2643_vm10 = vcmask 195712  }
 0x985   : > { %v1405_v47 = vmul.f32 %v1385_v1, %v4976_v8  ;;  %v1979_v56 = vpop.permute.xlu1 %1978  ;;  %v799_v53 = vsub.f32 1.0, %v798_v50  ;;  %vm834_vm14 = vmor %vm832_vm12, %vm833_vm9  ;;  %v734_v5 = vadd.f32 1.0, %v4045_v18 }
 0x986   : > { %v829_v30 = vsub.f32 1.0, %v828_v20  ;;  %v2002_v49 = vmul.f32 %v1979_v56, %v4991_v54 }
 0x987   : > { %1424 = vrot.lane.b32.xlu2 %v1405_v47, %s4068_s22  ;;  %v800_v41 = vmul.f32 %v4041_v32, %v799_v53  ;;  %4046 = vrcp.f32 %v734_v5  ;;  %vm817_vm4 = vweird.f32 %v734_v5  ;;  %v821_v47 = vand.u32 2147483647, %v734_v5 }
 0x988   : > { %v830_v28 = vmul.f32 %v4043_v14, %v829_v30  ;;  %v3662_v53 = vmul.f32 -1.442695, %v4333_v55 }
 0x989   : > { %v801_v46 = vadd.f32 %v4041_v32, %v800_v41  ;;  %vm822_vm6 = vcmp.eq.f32.partialorder %v821_v47, 8.507059e+37 }
 0x98a   : > { %v831_v63 = vadd.f32 %v4043_v14, %v830_v28  ;;  %4048 = vpow2.f32 %v3662_v53  ;;  %v3668_v28 = vmul.f32 -1.442695, %v4373_v3 }
 0x98b   : > { %v805_v4 = vsel %vm804_vm11, %v4041_v32, %v801_v46  ;;  %v823_v32 = vand.u32 2147483648, %v734_v5 }
 0x98c   : > { %v2586_v57 = vpop.permute.xlu2 %2585  ;;  %v835_v42 = vsel %vm834_vm14, %v4043_v14, %v831_v63  ;;  %v5007_v39 = vsel %vm807_vm15, %v809_v38, %v805_v4 }
 0x98d   : > { %v2606_v34 = vmul.f32 %v2586_v57, %v4976_v8  ;;  %v2580_v24 = vpop.permute.xlu0 %2579  ;;  %v1387_v22 = vpop.permute.xlu1 %1386  ;;  %v5009_v58 = vsel %vm837_vm2, %v839_v7, %v835_v42  ;;  %v824_v56 = vor.u32 1.1754944e-38, %v823_v32 }
 0x98e   : > { %v2603_v10 = vmul.f32 %v2580_v24, %v4991_v54  ;;  %v1406_v44 = vmul.f32 %v1387_v22, %v5007_v39  ;;  %v4047_v37 = vpop.eup %4046 }
 0x98f   : > { %2625 = vrot.lane.b32.xlu0 %v2606_v34, %s4068_s22  ;;  %v813_v6 = vmul.f32 %v4047_v37, %v734_v5  ;;  %vm818_vm3 = vweird.f32 %v4047_v37 }
 0x990   : > { %2619 = vrot.lane.b32.xlu2 %v2603_v10, %s4068_s22  ;;  %vm819_vm5 = vmor %vm817_vm4, %vm818_vm3  ;;  %v4049_v24 = vpop.eup %4048 }
 0x991   : > { %v814_v2 = vsub.f32 1.0, %v813_v6  ;;  %v730_v10 = vadd.f32 1.0, %v4049_v24 }
 0x993   : > { %v815_v27 = vmul.f32 %v4047_v37, %v814_v2  ;;  %4050 = vrcp.f32 %v730_v10  ;;  %v763_v42 = vand.u32 2147483648, %v730_v10  ;;  %vm757_vm9 = vweird.f32 %v730_v10 }
 0x994   : > { %v1379_v26 = vpop.permute.xlu2 %1378  ;;  %4052 = vpow2.f32 %v3668_v28  ;;  %v761_v38 = vand.u32 2147483647, %v730_v10 }
 0x995   : > { %v1402_v52 = vmul.f32 %v1379_v26, %v4991_v54  ;;  %v1987_v25 = vpop.permute.xlu1 %1986  ;;  %v2592_v60 = vpop.permute.xlu0 %2591  ;;  %v816_v1 = vadd.f32 %v4047_v37, %v815_v27 }
 0x996   : > { %v2006_v16 = vmul.f32 %v1987_v25, %v5007_v39  ;;  %v2609_v35 = vmul.f32 %v2592_v60, %v5009_v58  ;;  %vm762_vm12 = vcmp.eq.f32.partialorder %v761_v38, 8.507059e+37 }
 0x997   : > { %2018 = vrot.lane.b32.xlu0 %v2002_v49, %s4068_s22  ;;  %1418 = vrot.lane.b32.xlu1 %v1402_v52, %s4068_s22  ;;  %v820_v43 = vsel %vm819_vm5, %v4047_v37, %v816_v1 }
 0x998   : > { %v5035_v20 = vsel %vm822_vm6, %v824_v56, %v820_v43  ;;  %v3663_v56 = vmul.f32 -1.442695, %v4329_v51 }
 0x999   : > { %v4051_v22 = vpop.eup %4050 }
 0x99a   : > { %v753_v46 = vmul.f32 %v4051_v22, %v730_v10  ;;  %v4053_v63 = vpop.eup %4052  ;;  %vm758_vm8 = vweird.f32 %v4051_v22 }
 0x99b   : > { %v736_v36 = vadd.f32 1.0, %v4053_v63  ;;  %vm759_vm11 = vmor %vm757_vm9, %vm758_vm8  ;;  %vm3244_vm9 = vcmask 261312  }
 0x99c   : > { %v1391_v0 = vpop.permute.xlu2 %1390  ;;  %v754_v49 = vsub.f32 1.0, %v753_v46 }
 0x99d   : > { %v1408_v9 = vmul.f32 %v1391_v0, %v5009_v58  ;;  %v2588_v19 = vpop.permute.xlu1 %2587  ;;  %v1989_v29 = vpop.permute.xlu0 %1988  ;;  %4054 = vrcp.f32 %v736_v36  ;;  %v853_v32 = vand.u32 2147483648, %v736_v36  ;;  %vm847_vm15 = vweird.f32 %v736_v36 }
 0x99e   : > { %v2007_v23 = vmul.f32 %v1989_v29, %v5035_v20  ;;  %v755_v31 = vmul.f32 %v4051_v22, %v754_v49  ;;  %v2607_v3 = vmul.f32 %v2588_v19, %v5007_v39  ;;  %v851_v47 = vand.u32 2147483647, %v736_v36 }
 0x99f   : > { %1426 = vrot.lane.b32.xlu0 %v1406_v44, %s4068_s22  ;;  %2026 = vrot.lane.b32.xlu1 %v2006_v16, %s4068_s22  ;;  %v764_v44 = vor.u32 1.1754944e-38, %v763_v42  ;;  %4056 = vpow2.f32 %v3663_v56 }
 0x9a0   : > { %1430 = vrot.lane.b32.xlu2 %v1408_v9, %s4068_s22  ;;  %v756_v4 = vadd.f32 %v4051_v22, %v755_v31  ;;  %vm852_vm3 = vcmp.eq.f32.partialorder %v851_v47, 8.507059e+37 }
 0x9a2   : > { %v760_v25 = vsel %vm759_vm11, %v4051_v22, %v756_v4 }
 0x9a3   : > { %v5060_v16 = vsel %vm762_vm12, %v764_v44, %v760_v25  ;;  %v4055_v13 = vpop.eup %4054 }
 0x9a4   : > { %v5018_v11 = vpop.permute.xlu2 %1990  ;;  %v843_v19 = vmul.f32 %v4055_v13, %v736_v36  ;;  %vm848_vm14 = vweird.f32 %v4055_v13 }
 0x9a5   : > { %v5020_v15 = vpop.permute.xlu1 %1380  ;;  %v5053_v61 = vpop.permute.xlu0 %2593  ;;  %vm849_vm2 = vmor %vm847_vm15, %vm848_vm14 }
 0x9a6   : > { %v1403_v9 = vmul.f32 %v5020_v15, %v5060_v16  ;;  %v844_v6 = vsub.f32 1.0, %v843_v19  ;;  %v4057_v24 = vpop.eup %4056 }
 0x9a7   : > { %v731_v51 = vadd.f32 1.0, %v4057_v24 }
 0x9a9   : > { %4058 = vrcp.f32 %v731_v51  ;;  %v778_v63 = vand.u32 2147483648, %v731_v51  ;;  %vm772_vm5 = vweird.f32 %v731_v51  ;;  %v776_v31 = vand.u32 2147483647, %v731_v51 }
 0x9ab   : > { %vm777_vm8 = vcmp.eq.f32.partialorder %v776_v31, 8.507059e+37 }
 0x9ac   : > { %v5022_v62 = vpop.permute.xlu2 %1980 }
 0x9ad   : > { %v5024_v59 = vpop.permute.xlu1 %2581 }
 0x9ae   : > { %v2604_v1 = vmul.f32 %v5024_v59, %v5060_v16  ;;  %v2008_v59 = vmul.f32 %v5018_v11, %v5009_v58 }
 0x9b4   : > { %v5027_v48 = vpop.permute.xlu2 %1388 }
 0x9b5   : > { %v5030_v14 = vpop.permute.xlu1 %1392  ;;  %v1407_v28 = vmul.f32 %v5027_v48, %v5035_v20 }
 0x9bc   : > { %v5033_v40 = vpop.permute.xlu2 %1992 }
 0x9bd   : > { %v5040_v17 = vpop.permute.xlu1 %2589 }
 0x9be   : > { %v2608_v49 = vmul.f32 %v5040_v17, %v5035_v20 }
 0x9c3   : > { %v3065_v21 = vpop.f32.mrf.mxu0 }
 0x9c4   : > { %3186 = vrot.lane.b32.xlu1 %v3065_v21, %s4075_s10  ;;  %v5043_v57 = vpop.permute.xlu2 %1982  ;;  %v845_v21 = vmul.f32 %v4055_v13, %v844_v6 }
 0x9c5   : > { %v5045_v34 = vpop.permute.xlu1 %1382 }
 0x9cc   : > { %2631 = vrot.lane.b32.xlu1 %v2609_v35, %s4068_s22  ;;  %v846_v35 = vadd.f32 %v4055_v13, %v845_v21 }
 0x9cd   : > { %v5048_v41 = vpop.permute.xlu1 %2583 }
 0x9ce   : > { %v850_v43 = vsel %vm849_vm2, %v4055_v13, %v846_v35 }
 0x9d0   : > { %v2987_v50 = vpop.f32.mrf.mxu1 }
 0x9d1   : > { %3180 = vrot.lane.b32.xlu2 %v2987_v50, %s4075_s10  ;;  %v854_v50 = vor.u32 1.1754944e-38, %v853_v32 }
 0x9d4   : > { %2028 = vrot.lane.b32.xlu1 %v2007_v23, %s4068_s22  ;;  %v5078_v23 = vsel %vm852_vm3, %v854_v50, %v850_v43 }
 0x9d5   : > { %v1409_v53 = vmul.f32 %v5030_v14, %v5078_v23  ;;  %v4059_v14 = vpop.eup %4058  ;;  %v2610_v46 = vmul.f32 %v5053_v61, %v5078_v23  ;;  %v779_v61 = vor.u32 1.1754944e-38, %v778_v63 }
 0x9d6   : > { %v768_v11 = vmul.f32 %v4059_v14, %v731_v51  ;;  %vm773_vm4 = vweird.f32 %v4059_v14 }
 0x9d7   : > { %vm774_vm6 = vmor %vm772_vm5, %vm773_vm4 }
 0x9d9   : > { %v3039_v15 = vpop.f32.mrf.mxu3 }
 0x9e1   : > { %v1425_v30 = vpop.permute.xlu2 %1424  ;;  %v3013_v18 = vpop.f32.mrf.mxu2 }
 0x9e2   : > { %1445 = vst.msk [vmem:[#allocation2 + $0x18] sm:$0xff] %vm860_vm13, %v1425_v30  ;;  %v2003_v30 = vmul.f32 %v5022_v62, %v5060_v16  ;;  %v769_v62 = vsub.f32 1.0, %v768_v11 }
 0x9e4   : > { %v770_v48 = vmul.f32 %v4059_v14, %v769_v62 }
 0x9ea   : > { %v2620_v26 = vpop.permute.xlu2 %2619 }
 0x9f2   : > { %v2025_v55 = vpop.permute.xlu1 %2024 }
 0x9f3   : > { %2046 = vst.msk [vmem:[#allocation2 + $0x18] sm:$0xff] %vm2042_vm7, %v2025_v55 }
 0x9f6   : > { %v3091_v52 = vpop.f32.mrf.mxu1 }
 0x9f7   : > { %3188 = vrot.lane.b32.xlu2 %v3091_v52, %s4075_s10  ;;  %v771_v52 = vadd.f32 %v4059_v14, %v770_v48 }
 0x9f9   : > { %v3117_v2 = vpop.f32.mrf.mxu2 }
 0x9fa   : > { %v1431_v45 = vpop.permute.xlu2 %1430 }
 0x9fb   : > { %1448 = vst.msk [vmem:[#allocation2 + $0x30] sm:$0xff] %vm860_vm13, %v1431_v45 }
 0x9fc   : > { %v3143_v29 = vpop.f32.mrf.mxu3 }
 0x9ff   : > { %2627 = vrot.lane.b32.xlu2 %v2607_v3, %s4068_s22 }
 0xa01   : > { %v3169_v7 = vpop.f32.mrf.mxu0  ;;  %v2626_v0 = vpop.permute.xlu0 %2625 }
 0xa02   : > { %3194 = vrot.lane.b32.xlu0 %v3169_v7, %s4075_s10  ;;  %2647 = vst.msk [vmem:[#allocation2 + $0x18] sm:$0xff] %vm2643_vm10, %v2626_v0  ;;  %v3263_v0 = vld [vmem:[%s5264_s3 + $0x10] sm:$0xff] }
 0xa07   : > { %1420 = vrot.lane.b32.xlu2 %v1403_v9, %s4068_s22 }
 0xa09   : > { %v1419_v5 = vpop.permute.xlu1 %1418  ;;  %v2019_v37 = vpop.permute.xlu0 %2018 }
 0xa0a   : > { %1442 = vst.msk [vmem:[#allocation2] sm:$0xff] %vm860_vm13, %v1419_v5  ;;  %3182 = vrot.lane.b32.xlu0 %v3013_v18, %s4075_s10 }
 0xa0b   : > { %2043 = vst.msk [vmem:[#allocation2] sm:$0xff] %vm2042_vm7, %v2019_v37 }
 0xa0c   : > { %2644 = vst.msk [vmem:[#allocation2] sm:$0xff] %vm2643_vm10, %v2620_v26 }
 0xa0f   : > { %3190 = vrot.lane.b32.xlu2 %v3117_v2, %s4075_s10 }
 0xa11   : > { %v2027_v60 = vpop.permute.xlu1 %2026  ;;  %v1427_v27 = vpop.permute.xlu0 %1426 }
 0xa12   : > { %1446 = vst.msk [vmem:[#allocation2 + $0x20] sm:$0xff] %vm860_vm13, %v1427_v27  ;;  %3184 = vrot.lane.b32.xlu0 %v3039_v15, %s4075_s10 }
 0xa13   : > { %2047 = vst.msk [vmem:[#allocation2 + $0x20] sm:$0xff] %vm2042_vm7, %v2027_v60 }
 0xa17   : > { %2621 = vrot.lane.b32.xlu2 %v2604_v1, %s4068_s22 }
 0xa1a   : > { %3192 = vrot.lane.b32.xlu0 %v3143_v29, %s4075_s10 }
 0xa1f   : > { %1432 = vrot.lane.b32.xlu2 %v1409_v53, %s4068_s22 }
 0xa22   : > { %2030 = vrot.lane.b32.xlu0 %v2008_v59, %s4068_s22 }
 0xa2a   : > { %2020 = vrot.lane.b32.xlu0 %v2003_v30, %s4068_s22 }
 0xa2b   : > { %v3181_v10 = vpop.permute.xlu2 %3180 }
 0xa2c   : > { %v3204_v22 = vmul.f32 %v3181_v10, %v4991_v54  ;;  %v2009_v54 = vmul.f32 %v5033_v40, %v5078_v23 }
 0xa2e   : > { %3220 = vrot.lane.b32.xlu1 %v3204_v22, %s4068_s22 }
 0xa32   : > { %1428 = vrot.lane.b32.xlu0 %v1407_v28, %s4068_s22 }
 0xa36   : > { %v3187_v26 = vpop.permute.xlu1 %3186  ;;  %2633 = vrot.lane.b32.xlu1 %v2610_v46, %s4068_s22 }
 0xa37   : > { %v3207_v55 = vmul.f32 %v3187_v26, %v4976_v8  ;;  %v775_v8 = vsel %vm774_vm6, %v4059_v14, %v771_v52 }
 0xa38   : > { %v780_v40 = vsel %vm777_vm8, %v779_v61, %v775_v8 }
 0xa39   : > { %3226 = vrot.lane.b32.xlu2 %v3207_v55, %s4068_s22  ;;  %v1404_v45 = vmul.f32 %v5045_v34, %v780_v40  ;;  %v2605_v36 = vmul.f32 %v5048_v41, %v780_v40  ;;  %v2004_v41 = vmul.f32 %v5043_v57, %v780_v40  ;;  %v3261_v57 = vld [vmem:[%s5264_s3] sm:$0xff] }
 0xa3a   : > { %2032 = vrot.lane.b32.xlu0 %v2009_v54, %s4068_s22 }
 0xa3e   : > { %v2632_v37 = vpop.permute.xlu1 %2631 }
 0xa41   : > { %2629 = vrot.lane.b32.xlu2 %v2608_v49, %s4068_s22 }
 0xa49   : > { %1422 = vrot.lane.b32.xlu2 %v1404_v45, %s4068_s22 }
 0xa51   : > { %v3189_v3 = vpop.permute.xlu2 %3188  ;;  %2623 = vrot.lane.b32.xlu2 %v2605_v36, %s4068_s22 }
 0xa52   : > { %v3208_v17 = vmul.f32 %v3189_v3, %v5007_v39  ;;  %v3264_v39 = vld [vmem:[%s5264_s3 + $0x18] sm:$0xff] }
 0xa53   : > { %3775 = vmatpush.msrb.mxu2 %v3264_v39  ;;  %3301 = vmatpush.msrb.mxu1 %v3264_v39 }
 0xa54   : > { %3228 = vrot.lane.b32.xlu0 %v3208_v17, %s4068_s22  ;;  %3776 = vmatpush.msra.mxu3 %v3264_v39 }
 0xa55   : > { %3777 = vmatpush.msrb.mxu2 %v3263_v0  ;;  %3302 = vmatpush.msrb.mxu1 %v3263_v0 }
 0xa56   : > { %3778 = vmatpush.msra.mxu3 %v3263_v0 }
 0xa59   : > { %v2628_v4 = vpop.permute.xlu2 %2627 }
 0xa5a   : > { %2648 = vst.msk [vmem:[#allocation2 + $0x20] sm:$0xff] %vm2643_vm10, %v2628_v4 }
 0xa61   : > { %v1421_v42 = vpop.permute.xlu2 %1420 }
 0xa62   : > { %1443 = vst.msk [vmem:[#allocation2 + $0x8] sm:$0xff] %vm860_vm13, %v1421_v42 }
 0xa69   : > { %v3191_v38 = vpop.permute.xlu2 %3190 }
 0xa6a   : > { %v3209_v34 = vmul.f32 %v3191_v38, %v5035_v20  ;;  %v3262_v20 = vld [vmem:[%s5264_s3 + $0x8] sm:$0xff] }
 0xa6b   : > { %3779 = vmatpush.msrb.mxu2 %v3262_v20  ;;  %3303 = vmatpush.msrb.mxu1 %v3262_v20 }
 0xa6c   : > { %3230 = vrot.lane.b32.xlu0 %v3209_v34, %s4068_s22  ;;  %3780 = vmatpush.msra.mxu3 %v3262_v20 }
 0xa6d   : > { %3781 = vmatpush.msrb.mxu2 %v3261_v57  ;;  %3304 = vmatpush.msrb.mxu1 %v3261_v57 }
 0xa6e   : > { %3782 = vmatpush.msra.mxu3 %v3261_v57 }
 0xa71   : > { %v2622_v25 = vpop.permute.xlu2 %2621 }
 0xa74   : > { %2022 = vrot.lane.b32.xlu0 %v2004_v41, %s4068_s22  ;;  %v3195_v7 = vpop.permute.xlu0 %3194 }
 0xa75   : > { %v3211_v15 = vmul.f32 %v3195_v7, %v5078_v23 }
 0xa79   : > { %v1433_v44 = vpop.permute.xlu2 %1432 }
 0xa7a   : > { %1449 = vst.msk [vmem:[#allocation2 + $0x38] sm:$0xff] %vm860_vm13, %v1433_v44 }
 0xa7c   : > { %v3183_v9 = vpop.permute.xlu0 %3182 }
 0xa7d   : > { %v3205_v13 = vmul.f32 %v3183_v9, %v5060_v16  ;;  %v2029_v16 = vpop.permute.xlu1 %2028 }
 0xa7f   : > { %3222 = vrot.lane.b32.xlu1 %v3205_v13, %s4068_s22 }
 0xa84   : > { %v3185_v18 = vpop.permute.xlu0 %3184 }
 0xa85   : > { %v3206_v27 = vmul.f32 %v3185_v18, %v780_v40 }
 0xa8c   : > { %v3193_v19 = vpop.permute.xlu0 %3192 }
 0xa8d   : > { %v3210_v5 = vmul.f32 %v3193_v19, %v5009_v58 }
 0xa8f   : > { %3232 = vrot.lane.b32.xlu1 %v3210_v5, %s4068_s22 }
 0xa93   : > { %v3227_v6 = vpop.permute.xlu2 %3226 }
 0xa94   : > { %3248 = vst.msk [vmem:[#allocation2 + $0x18] sm:$0xff] %vm3244_vm9, %v3227_v6  ;;  %v2031_v2 = vpop.permute.xlu0 %2030 }
 0xa95   : > { %2049 = vst.msk [vmem:[#allocation2 + $0x30] sm:$0xff] %vm2042_vm7, %v2031_v2 }
 0xa96   : > { %2650 = vst.msk [vmem:[#allocation2 + $0x30] sm:$0xff] %vm2643_vm10, %v2632_v37 }
 0xa97   : > { %3234 = vrot.lane.b32.xlu1 %v3211_v15, %s4068_s22 }
 0xa9b   : > { %v2630_v21 = vpop.permute.xlu2 %2629  ;;  %v3256_v60 = vld [vmem:[#allocation2 + $0x18] sm:$0xff] }
 0xa9c   : > { %3768 = vmatmul.msk.f32.vlgmr.msrb.gmra.mxu2 %vm448_vm1, %v3256_v60  ;;  %v2021_v58 = vpop.permute.xlu0 %2020 }
 0xa9d   : > { %2044 = vst.msk [vmem:[#allocation2 + $0x8] sm:$0xff] %vm2042_vm7, %v2021_v58 }
 0xa9e   : > { %2645 = vst.msk [vmem:[#allocation2 + $0x8] sm:$0xff] %vm2643_vm10, %v2622_v25 }
 0xa9f   : > { %3224 = vrot.lane.b32.xlu1 %v3206_v27, %s4068_s22 }
 0xaa0   : > { %v3221_v35 = vpop.permute.xlu1 %3220 }
 0xaa1   : > { %3245 = vst.msk [vmem:[#allocation2] sm:$0xff] %vm3244_vm9, %v3221_v35 }
 0xaa3   : > { %v1423_v1 = vpop.permute.xlu2 %1422 }
 0xaa4   : > { %1444 = vst.msk [vmem:[#allocation2 + $0x10] sm:$0xff] %vm860_vm13, %v1423_v1  ;;  %v1429_v32 = vpop.permute.xlu0 %1428 }
 0xaa5   : > { %1447 = vst.msk [vmem:[#allocation2 + $0x28] sm:$0xff] %vm860_vm13, %v1429_v32  ;;  %vm3579_vm13 = vcmask 523264  }
 0xaa6   : > { %2048 = vst.msk [vmem:[#allocation2 + $0x28] sm:$0xff] %vm2042_vm7, %v2029_v16 }
 0xaa7   : > { %2649 = vst.msk [vmem:[#allocation2 + $0x28] sm:$0xff] %vm2643_vm10, %v2630_v21 }
 0xaa8   : > { %v3253_v47 = vld [vmem:[#allocation2] sm:$0xff]  ;;  %v2634_v56 = vpop.permute.xlu1 %2633 }
 0xaa9   : > { %3765 = vmatmul.msk.f32.vlgmr.msrb.gmra.mxu1 %vm448_vm1, %v3253_v47 }
 0xaab   : > { %v2624_v24 = vpop.permute.xlu2 %2623 }
 0xaac   : > { %v2033_v43 = vpop.permute.xlu0 %2032 }
 0xaad   : > { %2050 = vst.msk [vmem:[#allocation2 + $0x38] sm:$0xff] %vm2042_vm7, %v2033_v43 }
 0xaae   : > { %2651 = vst.msk [vmem:[#allocation2 + $0x38] sm:$0xff] %vm2643_vm10, %v2634_v56 }
 0xac6   : > { %v3229_v29 = vpop.permute.xlu0 %3228 }
 0xac7   : > { %3249 = vst.msk [vmem:[#allocation2 + $0x20] sm:$0xff] %vm3244_vm9, %v3229_v29 }
 0xace   : > { %v3257_v50 = vld [vmem:[#allocation2 + $0x20] sm:$0xff] }
 0xacf   : > { %3769 = vmatmul.msk.f32.gmra.mxu2 %vm448_vm1, %v3257_v50 }
 0xade   : > { %v3231_v23 = vpop.permute.xlu0 %3230 }
 0xadf   : > { %3250 = vst.msk [vmem:[#allocation2 + $0x28] sm:$0xff] %vm3244_vm9, %v3231_v23 }
 0xae6   : > { %v2023_v53 = vpop.permute.xlu0 %2022  ;;  %v3258_v59 = vld [vmem:[#allocation2 + $0x28] sm:$0xff] }
 0xae7   : > { %2045 = vst.msk [vmem:[#allocation2 + $0x10] sm:$0xff] %vm2042_vm7, %v2023_v53  ;;  %3770 = vmatmul.msk.f32.gmra.mxu2 %vm448_vm1, %v3258_v59  ;;  %vm3581_vm7 = vcmask 785408  }
 0xae8   : > { %2646 = vst.msk [vmem:[#allocation2 + $0x10] sm:$0xff] %vm2643_vm10, %v2624_v24 }
 0xaf1   : > { %v3223_v51 = vpop.permute.xlu1 %3222 }
 0xaf2   : > { %3246 = vst.msk [vmem:[#allocation2 + $0x8] sm:$0xff] %vm3244_vm9, %v3223_v51 }
 0xaf9   : > { %v3254_v30 = vld [vmem:[#allocation2 + $0x8] sm:$0xff] }
 0xafa   : > { %3766 = vmatmul.msk.f32.gmra.mxu1 %vm448_vm1, %v3254_v30 }
 0xb01   : > { %v3233_v10 = vpop.permute.xlu1 %3232 }
 0xb02   : > { %3251 = vst.msk [vmem:[#allocation2 + $0x30] sm:$0xff] %vm3244_vm9, %v3233_v10 }
 0xb09   : > { %v3235_v22 = vpop.permute.xlu1 %3234  ;;  %v3259_v14 = vld [vmem:[#allocation2 + $0x30] sm:$0xff] }
 0xb0a   : > { %3252 = vst.msk [vmem:[#allocation2 + $0x38] sm:$0xff] %vm3244_vm9, %v3235_v22  ;;  %3771 = vmatmul.msk.f32.vlgmr.msra.gmra.mxu3 %vm448_vm1, %v3259_v14 }
 0xb11   : > { %v3225_v28 = vpop.permute.xlu1 %3224  ;;  %v3260_v11 = vld [vmem:[#allocation2 + $0x38] sm:$0xff] }
 0xb12   : > { %3247 = vst.msk [vmem:[#allocation2 + $0x10] sm:$0xff] %vm3244_vm9, %v3225_v28  ;;  %3772 = vmatmul.msk.f32.gmra.mxu3 %vm448_vm1, %v3260_v11 }
 0xb19   : > { %v3255_v46 = vld [vmem:[#allocation2 + $0x10] sm:$0xff] }
 0xb1a   : > { %3767 = vmatmul.msk.f32.gmra.mxu1 %vm448_vm1, %v3255_v46 }
 0xb1f   : > { %v3315_v26 = vpop.f32.mrf.mxu2 }
 0xb20   : > { %v3342_v8 = vrot.slane %v3315_v26, 4 }
 0xb26   : > { %v3306_v62 = vpop.f32.mrf.mxu1 }
 0xb27   : > { %v3332_v42 = vrot.slane %v3306_v62, 4 }
 0xb52   : > { %v3318_v55 = vpop.f32.mrf.mxu2 }
 0xb53   : > { %v3356_v49 = vrot.slane %v3318_v55, 4 }
 0xb6a   : > { %v3321_v61 = vpop.f32.mrf.mxu2 }
 0xb6b   : > { %v3368_v17 = vrot.slane %v3321_v61, 4 }
 0xb77   : > { %v3309_v54 = vpop.f32.mrf.mxu1 }
 0xb78   : > { %v3344_v63 = vrot.slane %v3309_v54, 4  ;;  %v3343_v45 = vsel %vm224_vm0, %v3342_v8, %v3309_v54 }
 0xb79   : > { %v3349_v34 = vperm.slane %v3343_v45, %v4131_v12 }
 0xb7a   : > { %v3345_v36 = vsel %vm224_vm0, %v3315_v26, %v3344_v63 }
 0xb7b   : > { %v3353_v25 = vperm.slane %v3345_v36, %v4131_v12  ;;  %v3378_v6 = vrot.slane %v3349_v34, 4 }
 0xb7d   : > { %v3390_v2 = vrot.slane %v3353_v25, 4 }
 0xb8d   : > { %v3324_v48 = vpop.f32.mrf.mxu3 }
 0xb8e   : > { %v3354_v52 = vrot.slane %v3324_v48, 4  ;;  %v3357_v31 = vsel %vm224_vm0, %v3324_v48, %v3356_v49 }
 0xb8f   : > { %v3365_v3 = vperm.slane %v3357_v31, %v4131_v12 }
 0xb90   : > { %v3355_v40 = vsel %vm224_vm0, %v3354_v52, %v3318_v55 }
 0xb91   : > { %v3361_v4 = vperm.slane %v3355_v40, %v4131_v12  ;;  %v3416_v39 = vrot.slane %v3365_v3, 4 }
 0xb93   : > { %v3404_v44 = vrot.slane %v3361_v4, 4 }
 0xb95   : > { %v3327_v38 = vpop.f32.mrf.mxu3 }
 0xb96   : > { %v3366_v41 = vrot.slane %v3327_v38, 4  ;;  %v3369_v7 = vsel %vm224_vm0, %v3327_v38, %v3368_v17 }
 0xb97   : > { %v3377_v0 = vperm.slane %v3369_v7, %v4131_v12  ;;  %v3312_v20 = vpop.f32.mrf.mxu1 }
 0xb98   : > { %v3367_v57 = vsel %vm224_vm0, %v3366_v41, %v3321_v61  ;;  %v3330_v9 = vrot.slane %v3312_v20, 4  ;;  %v3333_v13 = vsel %vm224_vm0, %v3312_v20, %v3332_v42 }
 0xb99   : > { %v3373_v18 = vperm.slane %v3367_v57, %v4131_v12  ;;  %v3414_v19 = vrot.slane %v3377_v0, 4  ;;  %v3417_v5 = vsel %vm224_vm0, %v3377_v0, %v3416_v39  ;;  %v3341_v37 = vperm.slane %v3333_v13, %v4131_v12 }
 0xb9a   : > { %v3425_v15 = vperm.slane %v3417_v5, %v4142_v33  ;;  %v3331_v16 = vsel %vm224_vm0, %v3330_v9, %v3306_v62 }
 0xb9b   : > { %v3402_v21 = vrot.slane %v3373_v18, 4  ;;  %v3405_v60 = vsel %vm224_vm0, %v3373_v18, %v3404_v44  ;;  %v3415_v58 = vsel %vm224_vm0, %v3414_v19, %v3365_v3  ;;  %v3337_v27 = vperm.slane %v3331_v16, %v4131_v12 }
 0xb9c   : > { %v3413_v35 = vperm.slane %v3405_v60, %v4142_v33  ;;  %v3421_v1 = vperm.slane %v3415_v58, %v4142_v33  ;;  %v3391_v32 = vsel %vm224_vm0, %v3390_v2, %v3341_v37  ;;  %v3392_v29 = vrot.slane %v3341_v37, 4 }
 0xb9d   : > { %v3403_v47 = vsel %vm224_vm0, %v3402_v21, %v3361_v4  ;;  %v3379_v43 = vsel %vm224_vm0, %v3378_v6, %v3337_v27  ;;  %v3380_v56 = vrot.slane %v3337_v27, 4  ;;  %v3438_v53 = vrot.slane %v3425_v15, 4 }
 0xb9e   : > { %v3409_v50 = vperm.slane %v3403_v47, %v4142_v33  ;;  %v3434_v23 = vrot.slane %v3421_v1, 4  ;;  %v3385_v59 = vperm.slane %v3379_v43, %v4142_v33  ;;  %v3430_v24 = vrot.slane %v3413_v35, 4 }
 0xb9f   : > { %v3381_v51 = vsel %vm224_vm0, %v3349_v34, %v3380_v56  ;;  %v3393_v30 = vsel %vm224_vm0, %v3353_v25, %v3392_v29  ;;  %v3397_v10 = vperm.slane %v3391_v32, %v4142_v33 }
 0xba0   : > { %v3426_v22 = vrot.slane %v3409_v50, 4  ;;  %v3389_v14 = vperm.slane %v3381_v51, %v4142_v33  ;;  %v3401_v28 = vperm.slane %v3393_v30, %v4142_v33  ;;  %v3428_v11 = vrot.slane %v3385_v59, 4 }
 0xba1   : > { %v3435_v46 = vsel %vm224_vm0, %v3434_v23, %v3397_v10  ;;  %v3436_v26 = vrot.slane %v3397_v10, 4 }
 0xba2   : > { %v3427_v62 = vsel %vm224_vm0, %v3426_v22, %v3385_v59  ;;  %v3431_v55 = vsel %vm224_vm0, %v3430_v24, %v3389_v14  ;;  %v3432_v54 = vrot.slane %v3389_v14, 4  ;;  %v3439_v48 = vsel %vm224_vm0, %v3438_v53, %v3401_v28 }
 0xba3   : > { %v3437_v49 = vsel %vm224_vm0, %v3421_v1, %v3436_v26  ;;  %v3440_v52 = vrot.slane %v3401_v28, 4  ;;  %v3442_v63 = vrot.slane %v3431_v55, 4  ;;  %v3444_v31 = vrot.slane %v3427_v62, 4 }
 0xba4   : > { %v3466_v8 = vrot.slane %v3439_v48, 4  ;;  %v3468_v61 = vrot.slane %v3435_v46, 4  ;;  %v3480_v40 = vrot.slane %v3437_v49, 4  ;;  %v3429_v45 = vsel %vm224_vm0, %v3409_v50, %v3428_v11 }
 0xba5   : > { %v3441_v36 = vsel %vm224_vm0, %v3425_v15, %v3440_v52  ;;  %v3433_v3 = vsel %vm224_vm0, %v3413_v35, %v3432_v54  ;;  %v3443_v17 = vsel %vm224_vm0, %v3442_v63, %v3427_v62  ;;  %v3456_v4 = vrot.slane %v3429_v45, 4 }
 0xba6   : > { %v3467_v42 = vsel %vm224_vm0, %v3466_v8, %v3435_v46  ;;  %v3478_v38 = vrot.slane %v3441_v36, 4  ;;  %v3449_v34 = vperm.slane %v3443_v17, %v4131_v12  ;;  %v3454_v25 = vrot.slane %v3433_v3, 4 }
 0xba7   : > { %v3473_v41 = vperm.slane %v3467_v42, %v4131_v12  ;;  %v3445_v7 = vsel %vm224_vm0, %v3431_v55, %v3444_v31  ;;  %v3457_v39 = vsel %vm224_vm0, %v3433_v3, %v3456_v4  ;;  %v3469_v0 = vsel %vm224_vm0, %v3439_v48, %v3468_v61 }
 0xba8   : > { %v3455_v20 = vsel %vm224_vm0, %v3454_v25, %v3429_v45  ;;  %v3479_v44 = vsel %vm224_vm0, %v3478_v38, %v3437_v49  ;;  %v3492_v57 = vrot.slane %v3449_v34, 4  ;;  %v3453_v9 = vperm.slane %v3445_v7, %v4131_v12 }
 0xba9   : > { %v3461_v13 = vperm.slane %v3455_v20, %v4131_v12  ;;  %v3485_v18 = vperm.slane %v3479_v44, %v4131_v12  ;;  %v3516_v19 = vrot.slane %v3473_v41, 4  ;;  %v3465_v5 = vperm.slane %v3457_v39, %v4131_v12 }
 0xbaa   : > { %v3477_v37 = vperm.slane %v3469_v0, %v4131_v12  ;;  %v3481_v6 = vsel %vm224_vm0, %v3441_v36, %v3480_v40  ;;  %v3504_v2 = vrot.slane %v3453_v9, 4 }
 0xbab   : > { %v3493_v15 = vsel %vm224_vm0, %v3461_v13, %v3492_v57  ;;  %v3517_v16 = vsel %vm224_vm0, %v3485_v18, %v3516_v19  ;;  %v3489_v21 = vperm.slane %v3481_v6, %v4131_v12  ;;  %v3502_v60 = vrot.slane %v3465_v5, 4 }
 0xbac   : > { %v3501_v58 = vperm.slane %v3493_v15, %v4142_v33  ;;  %v3525_v27 = vperm.slane %v3517_v16, %v4142_v33  ;;  %v3490_v35 = vrot.slane %v3461_v13, 4  ;;  %v3514_v1 = vrot.slane %v3485_v18, 4 }
 0xbad   : > { %v3503_v32 = vsel %vm224_vm0, %v3502_v60, %v3453_v9  ;;  %v3526_v47 = vrot.slane %v3489_v21, 4  ;;  %v3528_v43 = vrot.slane %v3477_v37, 4  ;;  %v3505_v24 = vsel %vm224_vm0, %v3465_v5, %v3504_v2 }
 0xbae   : > { %v3542_v56 = vrot.slane %v3525_v27, 4  ;;  %v3509_v29 = vperm.slane %v3503_v32, %v4142_v33  ;;  %v3491_v50 = vsel %vm224_vm0, %v3490_v35, %v3449_v34  ;;  %v3515_v23 = vsel %vm224_vm0, %v3514_v1, %v3473_v41 }
 0xbaf   : > { %v3527_v12 = vsel %vm224_vm0, %v3526_v47, %v3477_v37  ;;  %v3497_v53 = vperm.slane %v3491_v50, %v4142_v33  ;;  %v3521_v59 = vperm.slane %v3515_v23, %v4142_v33  ;;  %v3529_v22 = vsel %vm224_vm0, %v3489_v21, %v3528_v43 }
 0xbb0   : > { %v3543_v51 = vsel %vm224_vm0, %v3542_v56, %v3501_v58  ;;  %v3533_v30 = vperm.slane %v3527_v12, %v4142_v33  ;;  %v3548_v10 = vrot.slane %v3509_v29, 4  ;;  %v3537_v28 = vperm.slane %v3529_v22, %v4142_v33 }
 0xbb1   : > { %3559 = vrot.lane.b32.xlu2 %v3543_v51, %s4070_s24  ;;  %v3540_v14 = vrot.slane %v3497_v53, 4  ;;  %v3513_v46 = vperm.slane %v3505_v24, %v4142_v33  ;;  %v3538_v62 = vrot.slane %v3521_v59, 4  ;;  %v3544_v63 = vrot.slane %v3501_v58, 4 }
 0xbb2   : > { %v3549_v11 = vsel %vm224_vm0, %v3533_v30, %v3548_v10  ;;  %v3546_v26 = vrot.slane %v3533_v30, 4  ;;  %v3550_v54 = vrot.slane %v3537_v28, 4 }
 0xbb3   : > { %3567 = vrot.lane.b32.xlu1 %v3549_v11, %s4068_s22  ;;  %v3541_v55 = vsel %vm224_vm0, %v3521_v59, %v3540_v14  ;;  %v3539_v49 = vsel %vm224_vm0, %v3538_v62, %v3497_v53  ;;  %v3552_v52 = vrot.slane %v3513_v46, 4  ;;  %v3545_v8 = vsel %vm224_vm0, %v3525_v27, %v3544_v63 }
 0xbb4   : > { %3555 = vrot.lane.b32.xlu0 %v3541_v55, %s4068_s22  ;;  %v3547_v48 = vsel %vm224_vm0, %v3546_v26, %v3509_v29  ;;  %v3551_v31 = vsel %vm224_vm0, %v3550_v54, %v3513_v46 }
 0xbb5   : > { %v3553_v33 = vsel %vm224_vm0, %v3537_v28, %v3552_v52 }
 0xbb9   : > { %3571 = vrot.lane.b32.xlu2 %v3551_v31, %s4070_s24 }
 0xbbb   : > { %3575 = vrot.lane.b32.xlu1 %v3553_v33, %s4069_s23 }
 0xbbc   : > { %3563 = vrot.lane.b32.xlu0 %v3545_v8, %s4069_s23 }
 0xc0b   : > { %v3560_v61 = vpop.permute.xlu2 %3559 }
 0xc13   : > { %v3572_v4 = vpop.permute.xlu2 %3571 }
 0xc25   : > { %v3568_v40 = vpop.permute.xlu1 %3567 }
 0xc26   : > { %v3556_v45 = vpop.permute.xlu0 %3555  ;;  %v3583_v3 = vsel %vm448_vm1, %v3547_v48, %v3568_v40 }
 0xc27   : > { %v3578_v36 = vsel %vm448_vm1, %v3539_v49, %v3556_v45  ;;  %v3584_v34 = vsel %vm3579_vm13, %v3583_v3, %v3572_v4 }
 0xc28   : > { %v3580_v38 = vsel %vm3579_vm13, %v3578_v36, %v3560_v61 }
 0xc2d   : > { %v3576_v17 = vpop.permute.xlu1 %3575 }
 0xc2e   : > { %v3564_v42 = vpop.permute.xlu0 %3563  ;;  %v3585_v41 = vsel %vm3581_vm7, %v3584_v34, %v3576_v17 }
 0xc2f   : > { %v3582_v25 = vsel %vm3581_vm7, %v3580_v38, %v3564_v42  ;;  %3587 = vst [vmem:[%s199_s6 + $0x8] sm:$0xff] %v3585_v41 }
 0xc30   : > { %3586 = vst [vmem:[%s199_s6] sm:$0xff] %v3582_v25 }
 0xc31 PF: > { %s14_s15 = sadd.s32 1, %s4066_s15  }
 0xc32   : > { %p11_p4 = scmp.ge.s32.totalorder %s14_s15, 4  }
 0xc34   :  { %13 = sbr.rel (!%p11_p4) target bundleno = 1 (0x1), region = 66 }

</bundles_post_ra>
